<compile_context>
chip_gen: v7x
topology: tpu7x:2x2x1
jax: 0.10.0
libtpu: 0.0.40
codegen_flags: <defaults>
</compile_context>

<pallas_src>
import jax
import jax.numpy as jnp
from jax import lax
from jax.experimental import pallas as pl
from jax.experimental.pallas import tpu as pltpu

# ---------------- hyperparameters (small, synthetic) ----------------
INPUT_DIM = 20     # src vocab
OUTPUT_DIM = 22    # trg vocab
EMB_DIM = 32
HID_DIM = 32
ENC_LAYERS = 2
DEC_LAYERS = 2
KERNEL_SIZE = 3
MAX_LEN = 50
TRG_PAD_IDX = 1
BATCH = 2
SRC_LEN = 8
TRG_LEN = 8
SCALE = 0.5 ** 0.5
PAD_OUT = 128      # lane-dense logits width; sliced back to OUTPUT_DIM in JAX


# ---------------- in-kernel helpers ----------------
def _shift_rows(x, s, pad_value):
    # y[i, :] = x[i + s, :] if 0 <= i + s < L else pad_value   (s is a static int)
    L = x.shape[0]
    if s == 0:
        return x
    rolled = pltpu.roll(x, shift=(-s) % L, axis=0)          # XLU sublane rotate
    row = lax.broadcasted_iota(jnp.int32, x.shape, 0)
    valid = jnp.logical_and(row + s >= 0, row + s < L)
    return jnp.where(valid, rolled, pad_value)


def _im2col(x, pad_left, pad_value):
    # x: [L, C] -> [L, K*C]; column block j holds rows shifted by (j - pad_left)
    return jnp.concatenate(
        [_shift_rows(x, j - pad_left, pad_value) for j in range(KERNEL_SIZE)],
        axis=1)


def _glu_conv(cols, wa, ba, wg, bg):
    # one MXU dot per GLU half (lane-aligned; no [:, :C]/[:, C:] accumulator split)
    a = jnp.dot(cols, wa, preferred_element_type=jnp.float32) + ba
    g = jnp.dot(cols, wg, preferred_element_type=jnp.float32) + bg
    return a * jax.nn.sigmoid(g)


# ---------------- fused Seq2Seq kernel (one grid step = one batch element) ----------
def _seq2seq_kernel(
        emb_src_ref, emb_trg_ref,
        e_e2h_w, e_e2h_b, e_wa, e_wg, e_ba, e_bg, e_h2e_w, e_h2e_b,
        d_e2h_w, d_e2h_b, d_wa, d_wg, d_ba, d_bg,
        a_h2e_w, a_h2e_b, a_e2h_w, a_e2h_b,
        d_h2e_w, d_h2e_b, fc_w, fc_b,
        out_ref, attn_ref):
    f32 = jnp.float32
    emb_s = emb_src_ref[0]          # [Ls, E]
    emb_t = emb_trg_ref[0]          # [Lt, E]

    def lin(x, w_ref, b_ref):
        return jnp.dot(x, w_ref[...], preferred_element_type=f32) + b_ref[...]

    # -------- encoder --------
    h = lin(emb_s, e_e2h_w, e_e2h_b)                       # [Ls, H]
    enc_pad = (KERNEL_SIZE - 1) // 2
    for l in range(ENC_LAYERS):
        cols = _im2col(h, enc_pad, 0.0)                    # [Ls, K*H]
        y = _glu_conv(cols, e_wa[l], e_ba[l], e_wg[l], e_bg[l])
        h = (y + h) * SCALE                                # residual + scale
    enc_conved = lin(h, e_h2e_w, e_h2e_b)                  # [Ls, E]
    enc_combined = (enc_conved + emb_s) * SCALE            # [Ls, E]

    # -------- decoder --------
    hd = lin(emb_t, d_e2h_w, d_e2h_b)                      # [Lt, H]
    p = None
    for l in range(DEC_LAYERS):
        # causal left pad filled with trg_pad_idx (matches reference ConvS2S decoder)
        cols = _im2col(hd, KERNEL_SIZE - 1, float(TRG_PAD_IDX))
        conved = _glu_conv(cols, d_wa[l], d_ba[l], d_wg[l], d_bg[l])   # [Lt, H]

        # attention
        conved_emb = lin(conved, a_h2e_w, a_h2e_b)         # [Lt, E]
        combined = (conved_emb + emb_t) * SCALE
        energy = lax.dot_general(combined, enc_conved,
                                 (((1,), (1,)), ((), ())),
                                 preferred_element_type=f32)           # [Lt, Ls]
        m = jnp.max(energy, axis=-1, keepdims=True)
        e = jnp.exp(energy - m)
        denom = jnp.sum(e, axis=-1, keepdims=True)
        p = e * pl.reciprocal(denom, approx=True)          # softmax (EUP recip)
        attended = jnp.dot(p, enc_combined, preferred_element_type=f32)  # [Lt, E]
        attended = lin(attended, a_e2h_w, a_e2h_b)         # [Lt, H]

        conved = (conved + attended) * SCALE
        hd = (conved + hd) * SCALE

    dec_emb = lin(hd, d_h2e_w, d_h2e_b)                    # [Lt, E]
    logits = lin(dec_emb, fc_w, fc_b)                      # [Lt, 128]  lane-dense
    out_ref[0] = logits.astype(out_ref.dtype)
    attn_ref[0] = p.astype(attn_ref.dtype)                 # last layer's attention


# ---------------- parameters ----------------
def init_params(key):
    ks = iter(jax.random.split(key, 64))
    nrm = lambda shape, s=0.02: jax.random.normal(next(ks), shape, jnp.float32) * s
    KH = KERNEL_SIZE * HID_DIM
    fc_w = nrm((EMB_DIM, OUTPUT_DIM))
    fc_b = nrm((1, OUTPUT_DIM))
    p = {
        # encoder
        "enc_tok_emb": nrm((INPUT_DIM, EMB_DIM)),
        "enc_pos_emb": nrm((MAX_LEN, EMB_DIM)),
        "enc_emb2hid_w": nrm((EMB_DIM, HID_DIM)), "enc_emb2hid_b": nrm((1, HID_DIM)),
        "enc_hid2emb_w": nrm((HID_DIM, EMB_DIM)), "enc_hid2emb_b": nrm((1, EMB_DIM)),
        "enc_conv_wa": nrm((ENC_LAYERS, KH, HID_DIM)),
        "enc_conv_wg": nrm((ENC_LAYERS, KH, HID_DIM)),
        "enc_conv_ba": nrm((ENC_LAYERS, 1, HID_DIM)),
        "enc_conv_bg": nrm((ENC_LAYERS, 1, HID_DIM)),
        # decoder
        "dec_tok_emb": nrm((OUTPUT_DIM, EMB_DIM)),
        "dec_pos_emb": nrm((MAX_LEN, EMB_DIM)),
        "dec_emb2hid_w": nrm((EMB_DIM, HID_DIM)), "dec_emb2hid_b": nrm((1, HID_DIM)),
        "dec_hid2emb_w": nrm((HID_DIM, EMB_DIM)), "dec_hid2emb_b": nrm((1, EMB_DIM)),
        "dec_conv_wa": nrm((DEC_LAYERS, KH, HID_DIM)),
        "dec_conv_wg": nrm((DEC_LAYERS, KH, HID_DIM)),
        "dec_conv_ba": nrm((DEC_LAYERS, 1, HID_DIM)),
        "dec_conv_bg": nrm((DEC_LAYERS, 1, HID_DIM)),
        "attn_hid2emb_w": nrm((HID_DIM, EMB_DIM)), "attn_hid2emb_b": nrm((1, EMB_DIM)),
        "attn_emb2hid_w": nrm((EMB_DIM, HID_DIM)), "attn_emb2hid_b": nrm((1, HID_DIM)),
        # fc_out zero-padded to 128 lanes (unmasked stores); sliced back in JAX
        "fc_out_w": jnp.pad(fc_w, ((0, 0), (0, PAD_OUT - OUTPUT_DIM))),
        "fc_out_b": jnp.pad(fc_b, ((0, 0), (0, PAD_OUT - OUTPUT_DIM))),
    }
    return p


# ---------------- forward (embedding glue in JAX, everything else fused Pallas) ----
def seq2seq_forward(params, src, trg):
    B, Ls = src.shape
    _, Lt = trg.shape
    # dropout is identity (eval-mode); embedding gathers stay in plain JAX
    emb_src = params["enc_tok_emb"][src] + params["enc_pos_emb"][jnp.arange(Ls)][None]
    emb_trg = params["dec_tok_emb"][trg] + params["dec_pos_emb"][jnp.arange(Lt)][None]

    weights = (
        params["enc_emb2hid_w"], params["enc_emb2hid_b"],
        params["enc_conv_wa"], params["enc_conv_wg"],
        params["enc_conv_ba"], params["enc_conv_bg"],
        params["enc_hid2emb_w"], params["enc_hid2emb_b"],
        params["dec_emb2hid_w"], params["dec_emb2hid_b"],
        params["dec_conv_wa"], params["dec_conv_wg"],
        params["dec_conv_ba"], params["dec_conv_bg"],
        params["attn_hid2emb_w"], params["attn_hid2emb_b"],
        params["attn_emb2hid_w"], params["attn_emb2hid_b"],
        params["dec_hid2emb_w"], params["dec_hid2emb_b"],
        params["fc_out_w"], params["fc_out_b"],
    )

    def batch_spec(shape):
        nd = len(shape)
        return pl.BlockSpec((1,) + tuple(shape[1:]),
                            lambda b, _nd=nd: (b,) + (0,) * (_nd - 1))

    def full_spec(arr):
        nd = arr.ndim
        return pl.BlockSpec(arr.shape, lambda b, _nd=nd: (0,) * _nd)

    in_specs = [batch_spec(emb_src.shape), batch_spec(emb_trg.shape)]
    in_specs += [full_spec(w) for w in weights]

    out_logits, attn = pl.pallas_call(
        _seq2seq_kernel,
        out_shape=(jax.ShapeDtypeStruct((B, Lt, PAD_OUT), jnp.float32),
                   jax.ShapeDtypeStruct((B, Lt, Ls), jnp.float32)),
        grid=(B,),
        in_specs=in_specs,
        out_specs=(pl.BlockSpec((1, Lt, PAD_OUT), lambda b: (b, 0, 0)),
                   pl.BlockSpec((1, Lt, Ls), lambda b: (b, 0, 0))),
        compiler_params=pltpu.CompilerParams(dimension_semantics=("parallel",)),
    )(emb_src, emb_trg, *weights)

    return out_logits[:, :, :OUTPUT_DIM], attn


if __name__ == "__main__":
    key = jax.random.PRNGKey(0)
    pkey, skey, tkey = jax.random.split(key, 3)
    params = init_params(pkey)
    src = jax.random.randint(skey, (BATCH, SRC_LEN), 0, INPUT_DIM, dtype=jnp.int32)
    trg = jax.random.randint(tkey, (BATCH, TRG_LEN), 0, OUTPUT_DIM, dtype=jnp.int32)

    output, attn = jax.jit(seq2seq_forward)(params, src, trg)
    jax.block_until_ready((output, attn))

    assert output.shape == (BATCH, TRG_LEN, OUTPUT_DIM), output.shape
    assert attn.shape == (BATCH, TRG_LEN, SRC_LEN), attn.shape
    assert bool(jnp.isfinite(output).all()) and bool(jnp.isfinite(attn).all())
    print("KERNEL_OK")
</pallas_src>

<mosaic_0001>
module attributes {stable_mosaic.version = 11 : i64} {
  func.func @_seq2seq_kernel(%arg0: i32, %arg1: memref<1x8x32xf32, #tpu.memory_space<vmem>>, %arg2: memref<1x8x32xf32, #tpu.memory_space<vmem>>, %arg3: memref<32x32xf32, #tpu.memory_space<vmem>>, %arg4: memref<1x32xf32, #tpu.memory_space<vmem>>, %arg5: memref<2x96x32xf32, #tpu.memory_space<vmem>>, %arg6: memref<2x96x32xf32, #tpu.memory_space<vmem>>, %arg7: memref<2x1x32xf32, #tpu.memory_space<vmem>>, %arg8: memref<2x1x32xf32, #tpu.memory_space<vmem>>, %arg9: memref<32x32xf32, #tpu.memory_space<vmem>>, %arg10: memref<1x32xf32, #tpu.memory_space<vmem>>, %arg11: memref<32x32xf32, #tpu.memory_space<vmem>>, %arg12: memref<1x32xf32, #tpu.memory_space<vmem>>, %arg13: memref<2x96x32xf32, #tpu.memory_space<vmem>>, %arg14: memref<2x96x32xf32, #tpu.memory_space<vmem>>, %arg15: memref<2x1x32xf32, #tpu.memory_space<vmem>>, %arg16: memref<2x1x32xf32, #tpu.memory_space<vmem>>, %arg17: memref<32x32xf32, #tpu.memory_space<vmem>>, %arg18: memref<1x32xf32, #tpu.memory_space<vmem>>, %arg19: memref<32x32xf32, #tpu.memory_space<vmem>>, %arg20: memref<1x32xf32, #tpu.memory_space<vmem>>, %arg21: memref<32x32xf32, #tpu.memory_space<vmem>>, %arg22: memref<1x32xf32, #tpu.memory_space<vmem>>, %arg23: memref<32x128xf32, #tpu.memory_space<vmem>>, %arg24: memref<1x128xf32, #tpu.memory_space<vmem>>, %arg25: memref<1x8x128xf32, #tpu.memory_space<vmem>>, %arg26: memref<1x8x8xf32, #tpu.memory_space<vmem>>) attributes {dimension_semantics = [#tpu.dimension_semantics<parallel>], iteration_bounds = array<i64: 2>, scalar_prefetch = 0 : i64, scratch_operands = 0 : i64, tpu.core_type = #tpu.core_type<tc>, window_params = [{transform_indices = @transform_0, window_bounds = array<i64: 1, 8, 32>}, {transform_indices = @transform_1, window_bounds = array<i64: 1, 8, 32>}, {pipeline_mode = #tpu.pipeline_mode<synchronous>, transform_indices = @transform_2, window_bounds = array<i64: 32, 32>}, {pipeline_mode = #tpu.pipeline_mode<synchronous>, transform_indices = @transform_3, window_bounds = array<i64: 1, 32>}, {pipeline_mode = #tpu.pipeline_mode<synchronous>, transform_indices = @transform_4, window_bounds = array<i64: 2, 96, 32>}, {pipeline_mode = #tpu.pipeline_mode<synchronous>, transform_indices = @transform_5, window_bounds = array<i64: 2, 96, 32>}, {pipeline_mode = #tpu.pipeline_mode<synchronous>, transform_indices = @transform_6, window_bounds = array<i64: 2, 1, 32>}, {pipeline_mode = #tpu.pipeline_mode<synchronous>, transform_indices = @transform_7, window_bounds = array<i64: 2, 1, 32>}, {pipeline_mode = #tpu.pipeline_mode<synchronous>, transform_indices = @transform_8, window_bounds = array<i64: 32, 32>}, {pipeline_mode = #tpu.pipeline_mode<synchronous>, transform_indices = @transform_9, window_bounds = array<i64: 1, 32>}, {pipeline_mode = #tpu.pipeline_mode<synchronous>, transform_indices = @transform_10, window_bounds = array<i64: 32, 32>}, {pipeline_mode = #tpu.pipeline_mode<synchronous>, transform_indices = @transform_11, window_bounds = array<i64: 1, 32>}, {pipeline_mode = #tpu.pipeline_mode<synchronous>, transform_indices = @transform_12, window_bounds = array<i64: 2, 96, 32>}, {pipeline_mode = #tpu.pipeline_mode<synchronous>, transform_indices = @transform_13, window_bounds = array<i64: 2, 96, 32>}, {pipeline_mode = #tpu.pipeline_mode<synchronous>, transform_indices = @transform_14, window_bounds = array<i64: 2, 1, 32>}, {pipeline_mode = #tpu.pipeline_mode<synchronous>, transform_indices = @transform_15, window_bounds = array<i64: 2, 1, 32>}, {pipeline_mode = #tpu.pipeline_mode<synchronous>, transform_indices = @transform_16, window_bounds = array<i64: 32, 32>}, {pipeline_mode = #tpu.pipeline_mode<synchronous>, transform_indices = @transform_17, window_bounds = array<i64: 1, 32>}, {pipeline_mode = #tpu.pipeline_mode<synchronous>, transform_indices = @transform_18, window_bounds = array<i64: 32, 32>}, {pipeline_mode = #tpu.pipeline_mode<synchronous>, transform_indices = @transform_19, window_bounds = array<i64: 1, 32>}, {pipeline_mode = #tpu.pipeline_mode<synchronous>, transform_indices = @transform_20, window_bounds = array<i64: 32, 32>}, {pipeline_mode = #tpu.pipeline_mode<synchronous>, transform_indices = @transform_21, window_bounds = array<i64: 1, 32>}, {pipeline_mode = #tpu.pipeline_mode<synchronous>, transform_indices = @transform_22, window_bounds = array<i64: 32, 128>}, {pipeline_mode = #tpu.pipeline_mode<synchronous>, transform_indices = @transform_23, window_bounds = array<i64: 1, 128>}, {transform_indices = @transform_24, window_bounds = array<i64: 1, 8, 128>}, {transform_indices = @transform_25, window_bounds = array<i64: 1, 8, 8>}]} {
    %c0 = arith.constant 0 : index
    %c0_0 = arith.constant 0 : index
    %c0_1 = arith.constant 0 : index
    %0 = vector.load %arg1[%c0, %c0_0, %c0_1] : memref<1x8x32xf32, #tpu.memory_space<vmem>>, vector<1x8x32xf32>
    %1 = vector.shape_cast %0 : vector<1x8x32xf32> to vector<8x32xf32>
    %c0_2 = arith.constant 0 : index
    %c0_3 = arith.constant 0 : index
    %c0_4 = arith.constant 0 : index
    %2 = vector.load %arg2[%c0_2, %c0_3, %c0_4] : memref<1x8x32xf32, #tpu.memory_space<vmem>>, vector<1x8x32xf32>
    %3 = vector.shape_cast %2 : vector<1x8x32xf32> to vector<8x32xf32>
    %c0_5 = arith.constant 0 : index
    %c0_6 = arith.constant 0 : index
    %4 = vector.load %arg3[%c0_5, %c0_6] : memref<32x32xf32, #tpu.memory_space<vmem>>, vector<32x32xf32>
    %cst = arith.constant dense<0.000000e+00> : vector<8x32xf32>
    %5 = tpu.matmul %1, %4, %cst {dimension_numbers = #tpu.dot_dimension_numbers<[1], [0], [0], [1], [0, 0, 1, 1], [], []>} : vector<8x32xf32>, vector<32x32xf32>, vector<8x32xf32> -> vector<8x32xf32>
    %c0_7 = arith.constant 0 : index
    %c0_8 = arith.constant 0 : index
    %6 = vector.load %arg4[%c0_7, %c0_8] : memref<1x32xf32, #tpu.memory_space<vmem>>, vector<1x32xf32>
    %7 = vector.broadcast %6 : vector<1x32xf32> to vector<8x32xf32>
    %8 = arith.addf %5, %7 : vector<8x32xf32>
    %c1_i32 = arith.constant 1 : i32
    %9 = tpu.dynamic_rotate %8 by %c1_i32 dim 0 : vector<8x32xf32>, i32 -> vector<8x32xf32>
    %10 = tpu.iota {dimensions = array<i32: 0>} : vector<8x32xi32>
    %c-1_i32 = arith.constant -1 : i32
    %11 = vector.broadcast %c-1_i32 : i32 to vector<8x32xi32>
    %12 = arith.addi %10, %11 : vector<8x32xi32>
    %c0_i32 = arith.constant 0 : i32
    %13 = vector.broadcast %c0_i32 : i32 to vector<8x32xi32>
    %14 = arith.cmpi sge, %12, %13 : vector<8x32xi32>
    %c-1_i32_9 = arith.constant -1 : i32
    %15 = vector.broadcast %c-1_i32_9 : i32 to vector<8x32xi32>
    %16 = arith.addi %10, %15 : vector<8x32xi32>
    %c8_i32 = arith.constant 8 : i32
    %17 = vector.broadcast %c8_i32 : i32 to vector<8x32xi32>
    %18 = arith.cmpi slt, %16, %17 : vector<8x32xi32>
    %19 = arith.andi %14, %18 : vector<8x32xi1>
    %cst_10 = arith.constant 0.000000e+00 : f32
    %20 = vector.broadcast %cst_10 : f32 to vector<8x32xf32>
    %21 = arith.select %19, %9, %20 : vector<8x32xi1>, vector<8x32xf32>
    %c7_i32 = arith.constant 7 : i32
    %22 = tpu.dynamic_rotate %8 by %c7_i32 dim 0 : vector<8x32xf32>, i32 -> vector<8x32xf32>
    %23 = tpu.iota {dimensions = array<i32: 0>} : vector<8x32xi32>
    %c1_i32_11 = arith.constant 1 : i32
    %24 = vector.broadcast %c1_i32_11 : i32 to vector<8x32xi32>
    %25 = arith.addi %23, %24 : vector<8x32xi32>
    %c0_i32_12 = arith.constant 0 : i32
    %26 = vector.broadcast %c0_i32_12 : i32 to vector<8x32xi32>
    %27 = arith.cmpi sge, %25, %26 : vector<8x32xi32>
    %c1_i32_13 = arith.constant 1 : i32
    %28 = vector.broadcast %c1_i32_13 : i32 to vector<8x32xi32>
    %29 = arith.addi %23, %28 : vector<8x32xi32>
    %c8_i32_14 = arith.constant 8 : i32
    %30 = vector.broadcast %c8_i32_14 : i32 to vector<8x32xi32>
    %31 = arith.cmpi slt, %29, %30 : vector<8x32xi32>
    %32 = arith.andi %27, %31 : vector<8x32xi1>
    %cst_15 = arith.constant 0.000000e+00 : f32
    %33 = vector.broadcast %cst_15 : f32 to vector<8x32xf32>
    %34 = arith.select %32, %22, %33 : vector<8x32xi1>, vector<8x32xf32>
    %35 = tpu.concatenate %21, %8, %34 in 1 : vector<8x32xf32>, vector<8x32xf32>, vector<8x32xf32> -> vector<8x96xf32>
    %c0_16 = arith.constant 0 : index
    %c0_17 = arith.constant 0 : index
    %c0_18 = arith.constant 0 : index
    %36 = vector.load %arg5[%c0_16, %c0_17, %c0_18] : memref<2x96x32xf32, #tpu.memory_space<vmem>>, vector<1x96x32xf32>
    %37 = vector.shape_cast %36 : vector<1x96x32xf32> to vector<96x32xf32>
    %c0_19 = arith.constant 0 : index
    %c0_20 = arith.constant 0 : index
    %c0_21 = arith.constant 0 : index
    %38 = vector.load %arg7[%c0_19, %c0_20, %c0_21] : memref<2x1x32xf32, #tpu.memory_space<vmem>>, vector<1x1x32xf32>
    %39 = vector.shape_cast %38 : vector<1x1x32xf32> to vector<1x32xf32>
    %c0_22 = arith.constant 0 : index
    %c0_23 = arith.constant 0 : index
    %c0_24 = arith.constant 0 : index
    %40 = vector.load %arg6[%c0_22, %c0_23, %c0_24] : memref<2x96x32xf32, #tpu.memory_space<vmem>>, vector<1x96x32xf32>
    %41 = vector.shape_cast %40 : vector<1x96x32xf32> to vector<96x32xf32>
    %c0_25 = arith.constant 0 : index
    %c0_26 = arith.constant 0 : index
    %c0_27 = arith.constant 0 : index
    %42 = vector.load %arg8[%c0_25, %c0_26, %c0_27] : memref<2x1x32xf32, #tpu.memory_space<vmem>>, vector<1x1x32xf32>
    %43 = vector.shape_cast %42 : vector<1x1x32xf32> to vector<1x32xf32>
    %cst_28 = arith.constant dense<0.000000e+00> : vector<8x32xf32>
    %44 = tpu.matmul %35, %37, %cst_28 {dimension_numbers = #tpu.dot_dimension_numbers<[1], [0], [0], [1], [0, 0, 1, 1], [], []>} : vector<8x96xf32>, vector<96x32xf32>, vector<8x32xf32> -> vector<8x32xf32>
    %45 = vector.broadcast %39 : vector<1x32xf32> to vector<8x32xf32>
    %46 = arith.addf %44, %45 : vector<8x32xf32>
    %cst_29 = arith.constant dense<0.000000e+00> : vector<8x32xf32>
    %47 = tpu.matmul %35, %41, %cst_29 {dimension_numbers = #tpu.dot_dimension_numbers<[1], [0], [0], [1], [0, 0, 1, 1], [], []>} : vector<8x96xf32>, vector<96x32xf32>, vector<8x32xf32> -> vector<8x32xf32>
    %48 = vector.broadcast %43 : vector<1x32xf32> to vector<8x32xf32>
    %49 = arith.addf %47, %48 : vector<8x32xf32>
    %50 = arith.negf %49 : vector<8x32xf32>
    %51 = math.exp %50 : vector<8x32xf32>
    %cst_30 = arith.constant 1.000000e+00 : f32
    %52 = vector.broadcast %cst_30 : f32 to vector<8x32xf32>
    %53 = arith.addf %52, %51 : vector<8x32xf32>
    %54 = arith.divf %52, %53 : vector<8x32xf32>
    %55 = arith.mulf %46, %54 : vector<8x32xf32>
    %56 = arith.addf %55, %8 : vector<8x32xf32>
    %cst_31 = arith.constant 0.707106769 : f32
    %57 = vector.broadcast %cst_31 : f32 to vector<8x32xf32>
    %58 = arith.mulf %56, %57 : vector<8x32xf32>
    %c1_i32_32 = arith.constant 1 : i32
    %59 = tpu.dynamic_rotate %58 by %c1_i32_32 dim 0 : vector<8x32xf32>, i32 -> vector<8x32xf32>
    %60 = tpu.iota {dimensions = array<i32: 0>} : vector<8x32xi32>
    %c-1_i32_33 = arith.constant -1 : i32
    %61 = vector.broadcast %c-1_i32_33 : i32 to vector<8x32xi32>
    %62 = arith.addi %60, %61 : vector<8x32xi32>
    %c0_i32_34 = arith.constant 0 : i32
    %63 = vector.broadcast %c0_i32_34 : i32 to vector<8x32xi32>
    %64 = arith.cmpi sge, %62, %63 : vector<8x32xi32>
    %c-1_i32_35 = arith.constant -1 : i32
    %65 = vector.broadcast %c-1_i32_35 : i32 to vector<8x32xi32>
    %66 = arith.addi %60, %65 : vector<8x32xi32>
    %c8_i32_36 = arith.constant 8 : i32
    %67 = vector.broadcast %c8_i32_36 : i32 to vector<8x32xi32>
    %68 = arith.cmpi slt, %66, %67 : vector<8x32xi32>
    %69 = arith.andi %64, %68 : vector<8x32xi1>
    %cst_37 = arith.constant 0.000000e+00 : f32
    %70 = vector.broadcast %cst_37 : f32 to vector<8x32xf32>
    %71 = arith.select %69, %59, %70 : vector<8x32xi1>, vector<8x32xf32>
    %c7_i32_38 = arith.constant 7 : i32
    %72 = tpu.dynamic_rotate %58 by %c7_i32_38 dim 0 : vector<8x32xf32>, i32 -> vector<8x32xf32>
    %73 = tpu.iota {dimensions = array<i32: 0>} : vector<8x32xi32>
    %c1_i32_39 = arith.constant 1 : i32
    %74 = vector.broadcast %c1_i32_39 : i32 to vector<8x32xi32>
    %75 = arith.addi %73, %74 : vector<8x32xi32>
    %c0_i32_40 = arith.constant 0 : i32
    %76 = vector.broadcast %c0_i32_40 : i32 to vector<8x32xi32>
    %77 = arith.cmpi sge, %75, %76 : vector<8x32xi32>
    %c1_i32_41 = arith.constant 1 : i32
    %78 = vector.broadcast %c1_i32_41 : i32 to vector<8x32xi32>
    %79 = arith.addi %73, %78 : vector<8x32xi32>
    %c8_i32_42 = arith.constant 8 : i32
    %80 = vector.broadcast %c8_i32_42 : i32 to vector<8x32xi32>
    %81 = arith.cmpi slt, %79, %80 : vector<8x32xi32>
    %82 = arith.andi %77, %81 : vector<8x32xi1>
    %cst_43 = arith.constant 0.000000e+00 : f32
    %83 = vector.broadcast %cst_43 : f32 to vector<8x32xf32>
    %84 = arith.select %82, %72, %83 : vector<8x32xi1>, vector<8x32xf32>
    %85 = tpu.concatenate %71, %58, %84 in 1 : vector<8x32xf32>, vector<8x32xf32>, vector<8x32xf32> -> vector<8x96xf32>
    %c1 = arith.constant 1 : index
    %c0_44 = arith.constant 0 : index
    %c0_45 = arith.constant 0 : index
    %86 = vector.load %arg5[%c1, %c0_44, %c0_45] : memref<2x96x32xf32, #tpu.memory_space<vmem>>, vector<1x96x32xf32>
    %87 = vector.shape_cast %86 : vector<1x96x32xf32> to vector<96x32xf32>
    %c1_46 = arith.constant 1 : index
    %c0_47 = arith.constant 0 : index
    %c0_48 = arith.constant 0 : index
    %88 = vector.load %arg7[%c1_46, %c0_47, %c0_48] : memref<2x1x32xf32, #tpu.memory_space<vmem>>, vector<1x1x32xf32>
    %89 = vector.shape_cast %88 : vector<1x1x32xf32> to vector<1x32xf32>
    %c1_49 = arith.constant 1 : index
    %c0_50 = arith.constant 0 : index
    %c0_51 = arith.constant 0 : index
    %90 = vector.load %arg6[%c1_49, %c0_50, %c0_51] : memref<2x96x32xf32, #tpu.memory_space<vmem>>, vector<1x96x32xf32>
    %91 = vector.shape_cast %90 : vector<1x96x32xf32> to vector<96x32xf32>
    %c1_52 = arith.constant 1 : index
    %c0_53 = arith.constant 0 : index
    %c0_54 = arith.constant 0 : index
    %92 = vector.load %arg8[%c1_52, %c0_53, %c0_54] : memref<2x1x32xf32, #tpu.memory_space<vmem>>, vector<1x1x32xf32>
    %93 = vector.shape_cast %92 : vector<1x1x32xf32> to vector<1x32xf32>
    %cst_55 = arith.constant dense<0.000000e+00> : vector<8x32xf32>
    %94 = tpu.matmul %85, %87, %cst_55 {dimension_numbers = #tpu.dot_dimension_numbers<[1], [0], [0], [1], [0, 0, 1, 1], [], []>} : vector<8x96xf32>, vector<96x32xf32>, vector<8x32xf32> -> vector<8x32xf32>
    %95 = vector.broadcast %89 : vector<1x32xf32> to vector<8x32xf32>
    %96 = arith.addf %94, %95 : vector<8x32xf32>
    %cst_56 = arith.constant dense<0.000000e+00> : vector<8x32xf32>
    %97 = tpu.matmul %85, %91, %cst_56 {dimension_numbers = #tpu.dot_dimension_numbers<[1], [0], [0], [1], [0, 0, 1, 1], [], []>} : vector<8x96xf32>, vector<96x32xf32>, vector<8x32xf32> -> vector<8x32xf32>
    %98 = vector.broadcast %93 : vector<1x32xf32> to vector<8x32xf32>
    %99 = arith.addf %97, %98 : vector<8x32xf32>
    %100 = arith.negf %99 : vector<8x32xf32>
    %101 = math.exp %100 : vector<8x32xf32>
    %cst_57 = arith.constant 1.000000e+00 : f32
    %102 = vector.broadcast %cst_57 : f32 to vector<8x32xf32>
    %103 = arith.addf %102, %101 : vector<8x32xf32>
    %104 = arith.divf %102, %103 : vector<8x32xf32>
    %105 = arith.mulf %96, %104 : vector<8x32xf32>
    %106 = arith.addf %105, %58 : vector<8x32xf32>
    %cst_58 = arith.constant 0.707106769 : f32
    %107 = vector.broadcast %cst_58 : f32 to vector<8x32xf32>
    %108 = arith.mulf %106, %107 : vector<8x32xf32>
    %c0_59 = arith.constant 0 : index
    %c0_60 = arith.constant 0 : index
    %109 = vector.load %arg9[%c0_59, %c0_60] : memref<32x32xf32, #tpu.memory_space<vmem>>, vector<32x32xf32>
    %cst_61 = arith.constant dense<0.000000e+00> : vector<8x32xf32>
    %110 = tpu.matmul %108, %109, %cst_61 {dimension_numbers = #tpu.dot_dimension_numbers<[1], [0], [0], [1], [0, 0, 1, 1], [], []>} : vector<8x32xf32>, vector<32x32xf32>, vector<8x32xf32> -> vector<8x32xf32>
    %c0_62 = arith.constant 0 : index
    %c0_63 = arith.constant 0 : index
    %111 = vector.load %arg10[%c0_62, %c0_63] : memref<1x32xf32, #tpu.memory_space<vmem>>, vector<1x32xf32>
    %112 = vector.broadcast %111 : vector<1x32xf32> to vector<8x32xf32>
    %113 = arith.addf %110, %112 : vector<8x32xf32>
    %114 = arith.addf %113, %1 : vector<8x32xf32>
    %cst_64 = arith.constant 0.707106769 : f32
    %115 = vector.broadcast %cst_64 : f32 to vector<8x32xf32>
    %116 = arith.mulf %114, %115 : vector<8x32xf32>
    %c0_65 = arith.constant 0 : index
    %c0_66 = arith.constant 0 : index
    %117 = vector.load %arg11[%c0_65, %c0_66] : memref<32x32xf32, #tpu.memory_space<vmem>>, vector<32x32xf32>
    %cst_67 = arith.constant dense<0.000000e+00> : vector<8x32xf32>
    %118 = tpu.matmul %3, %117, %cst_67 {dimension_numbers = #tpu.dot_dimension_numbers<[1], [0], [0], [1], [0, 0, 1, 1], [], []>} : vector<8x32xf32>, vector<32x32xf32>, vector<8x32xf32> -> vector<8x32xf32>
    %c0_68 = arith.constant 0 : index
    %c0_69 = arith.constant 0 : index
    %119 = vector.load %arg12[%c0_68, %c0_69] : memref<1x32xf32, #tpu.memory_space<vmem>>, vector<1x32xf32>
    %120 = vector.broadcast %119 : vector<1x32xf32> to vector<8x32xf32>
    %121 = arith.addf %118, %120 : vector<8x32xf32>
    %c2_i32 = arith.constant 2 : i32
    %122 = tpu.dynamic_rotate %121 by %c2_i32 dim 0 : vector<8x32xf32>, i32 -> vector<8x32xf32>
    %123 = tpu.iota {dimensions = array<i32: 0>} : vector<8x32xi32>
    %c-2_i32 = arith.constant -2 : i32
    %124 = vector.broadcast %c-2_i32 : i32 to vector<8x32xi32>
    %125 = arith.addi %123, %124 : vector<8x32xi32>
    %c0_i32_70 = arith.constant 0 : i32
    %126 = vector.broadcast %c0_i32_70 : i32 to vector<8x32xi32>
    %127 = arith.cmpi sge, %125, %126 : vector<8x32xi32>
    %c-2_i32_71 = arith.constant -2 : i32
    %128 = vector.broadcast %c-2_i32_71 : i32 to vector<8x32xi32>
    %129 = arith.addi %123, %128 : vector<8x32xi32>
    %c8_i32_72 = arith.constant 8 : i32
    %130 = vector.broadcast %c8_i32_72 : i32 to vector<8x32xi32>
    %131 = arith.cmpi slt, %129, %130 : vector<8x32xi32>
    %132 = arith.andi %127, %131 : vector<8x32xi1>
    %cst_73 = arith.constant 1.000000e+00 : f32
    %133 = vector.broadcast %cst_73 : f32 to vector<8x32xf32>
    %134 = arith.select %132, %122, %133 : vector<8x32xi1>, vector<8x32xf32>
    %c1_i32_74 = arith.constant 1 : i32
    %135 = tpu.dynamic_rotate %121 by %c1_i32_74 dim 0 : vector<8x32xf32>, i32 -> vector<8x32xf32>
    %136 = tpu.iota {dimensions = array<i32: 0>} : vector<8x32xi32>
    %c-1_i32_75 = arith.constant -1 : i32
    %137 = vector.broadcast %c-1_i32_75 : i32 to vector<8x32xi32>
    %138 = arith.addi %136, %137 : vector<8x32xi32>
    %c0_i32_76 = arith.constant 0 : i32
    %139 = vector.broadcast %c0_i32_76 : i32 to vector<8x32xi32>
    %140 = arith.cmpi sge, %138, %139 : vector<8x32xi32>
    %c-1_i32_77 = arith.constant -1 : i32
    %141 = vector.broadcast %c-1_i32_77 : i32 to vector<8x32xi32>
    %142 = arith.addi %136, %141 : vector<8x32xi32>
    %c8_i32_78 = arith.constant 8 : i32
    %143 = vector.broadcast %c8_i32_78 : i32 to vector<8x32xi32>
    %144 = arith.cmpi slt, %142, %143 : vector<8x32xi32>
    %145 = arith.andi %140, %144 : vector<8x32xi1>
    %cst_79 = arith.constant 1.000000e+00 : f32
    %146 = vector.broadcast %cst_79 : f32 to vector<8x32xf32>
    %147 = arith.select %145, %135, %146 : vector<8x32xi1>, vector<8x32xf32>
    %148 = tpu.concatenate %134, %147, %121 in 1 : vector<8x32xf32>, vector<8x32xf32>, vector<8x32xf32> -> vector<8x96xf32>
    %c0_80 = arith.constant 0 : index
    %c0_81 = arith.constant 0 : index
    %c0_82 = arith.constant 0 : index
    %149 = vector.load %arg13[%c0_80, %c0_81, %c0_82] : memref<2x96x32xf32, #tpu.memory_space<vmem>>, vector<1x96x32xf32>
    %150 = vector.shape_cast %149 : vector<1x96x32xf32> to vector<96x32xf32>
    %c0_83 = arith.constant 0 : index
    %c0_84 = arith.constant 0 : index
    %c0_85 = arith.constant 0 : index
    %151 = vector.load %arg15[%c0_83, %c0_84, %c0_85] : memref<2x1x32xf32, #tpu.memory_space<vmem>>, vector<1x1x32xf32>
    %152 = vector.shape_cast %151 : vector<1x1x32xf32> to vector<1x32xf32>
    %c0_86 = arith.constant 0 : index
    %c0_87 = arith.constant 0 : index
    %c0_88 = arith.constant 0 : index
    %153 = vector.load %arg14[%c0_86, %c0_87, %c0_88] : memref<2x96x32xf32, #tpu.memory_space<vmem>>, vector<1x96x32xf32>
    %154 = vector.shape_cast %153 : vector<1x96x32xf32> to vector<96x32xf32>
    %c0_89 = arith.constant 0 : index
    %c0_90 = arith.constant 0 : index
    %c0_91 = arith.constant 0 : index
    %155 = vector.load %arg16[%c0_89, %c0_90, %c0_91] : memref<2x1x32xf32, #tpu.memory_space<vmem>>, vector<1x1x32xf32>
    %156 = vector.shape_cast %155 : vector<1x1x32xf32> to vector<1x32xf32>
    %cst_92 = arith.constant dense<0.000000e+00> : vector<8x32xf32>
    %157 = tpu.matmul %148, %150, %cst_92 {dimension_numbers = #tpu.dot_dimension_numbers<[1], [0], [0], [1], [0, 0, 1, 1], [], []>} : vector<8x96xf32>, vector<96x32xf32>, vector<8x32xf32> -> vector<8x32xf32>
    %158 = vector.broadcast %152 : vector<1x32xf32> to vector<8x32xf32>
    %159 = arith.addf %157, %158 : vector<8x32xf32>
    %cst_93 = arith.constant dense<0.000000e+00> : vector<8x32xf32>
    %160 = tpu.matmul %148, %154, %cst_93 {dimension_numbers = #tpu.dot_dimension_numbers<[1], [0], [0], [1], [0, 0, 1, 1], [], []>} : vector<8x96xf32>, vector<96x32xf32>, vector<8x32xf32> -> vector<8x32xf32>
    %161 = vector.broadcast %156 : vector<1x32xf32> to vector<8x32xf32>
    %162 = arith.addf %160, %161 : vector<8x32xf32>
    %163 = arith.negf %162 : vector<8x32xf32>
    %164 = math.exp %163 : vector<8x32xf32>
    %cst_94 = arith.constant 1.000000e+00 : f32
    %165 = vector.broadcast %cst_94 : f32 to vector<8x32xf32>
    %166 = arith.addf %165, %164 : vector<8x32xf32>
    %167 = arith.divf %165, %166 : vector<8x32xf32>
    %168 = arith.mulf %159, %167 : vector<8x32xf32>
    %c0_95 = arith.constant 0 : index
    %c0_96 = arith.constant 0 : index
    %169 = vector.load %arg17[%c0_95, %c0_96] : memref<32x32xf32, #tpu.memory_space<vmem>>, vector<32x32xf32>
    %cst_97 = arith.constant dense<0.000000e+00> : vector<8x32xf32>
    %170 = tpu.matmul %168, %169, %cst_97 {dimension_numbers = #tpu.dot_dimension_numbers<[1], [0], [0], [1], [0, 0, 1, 1], [], []>} : vector<8x32xf32>, vector<32x32xf32>, vector<8x32xf32> -> vector<8x32xf32>
    %c0_98 = arith.constant 0 : index
    %c0_99 = arith.constant 0 : index
    %171 = vector.load %arg18[%c0_98, %c0_99] : memref<1x32xf32, #tpu.memory_space<vmem>>, vector<1x32xf32>
    %172 = vector.broadcast %171 : vector<1x32xf32> to vector<8x32xf32>
    %173 = arith.addf %170, %172 : vector<8x32xf32>
    %174 = arith.addf %173, %3 : vector<8x32xf32>
    %cst_100 = arith.constant 0.707106769 : f32
    %175 = vector.broadcast %cst_100 : f32 to vector<8x32xf32>
    %176 = arith.mulf %174, %175 : vector<8x32xf32>
    %cst_101 = arith.constant dense<0.000000e+00> : vector<8x8xf32>
    %177 = tpu.matmul %176, %113, %cst_101 {dimension_numbers = #tpu.dot_dimension_numbers<[1], [1], [0], [0], [0, 0, 1, 0], [], []>} : vector<8x32xf32>, vector<8x32xf32>, vector<8x8xf32> -> vector<8x8xf32>
    %cst_102 = arith.constant dense<0xFF800000> : vector<8xf32>
    %178 = vector.multi_reduction <maximumf>, %177, %cst_102 [1] : vector<8x8xf32> to vector<8xf32>
    %179 = vector.shape_cast %178 : vector<8xf32> to vector<8x1xf32>
    %180 = vector.broadcast %179 : vector<8x1xf32> to vector<8x8xf32>
    %181 = arith.subf %177, %180 : vector<8x8xf32>
    %182 = math.exp %181 : vector<8x8xf32>
    %cst_103 = arith.constant dense<0.000000e+00> : vector<8xf32>
    %183 = vector.multi_reduction <add>, %182, %cst_103 [1] : vector<8x8xf32> to vector<8xf32>
    %184 = vector.shape_cast %183 : vector<8xf32> to vector<8x1xf32>
    %185 = tpu.reciprocal %184 {approx = true} : vector<8x1xf32> -> vector<8x1xf32>
    %186 = vector.broadcast %185 : vector<8x1xf32> to vector<8x8xf32>
    %187 = arith.mulf %182, %186 : vector<8x8xf32>
    %cst_104 = arith.constant dense<0.000000e+00> : vector<8x32xf32>
    %188 = tpu.matmul %187, %116, %cst_104 {dimension_numbers = #tpu.dot_dimension_numbers<[1], [0], [0], [1], [0, 0, 1, 1], [], []>} : vector<8x8xf32>, vector<8x32xf32>, vector<8x32xf32> -> vector<8x32xf32>
    %c0_105 = arith.constant 0 : index
    %c0_106 = arith.constant 0 : index
    %189 = vector.load %arg19[%c0_105, %c0_106] : memref<32x32xf32, #tpu.memory_space<vmem>>, vector<32x32xf32>
    %cst_107 = arith.constant dense<0.000000e+00> : vector<8x32xf32>
    %190 = tpu.matmul %188, %189, %cst_107 {dimension_numbers = #tpu.dot_dimension_numbers<[1], [0], [0], [1], [0, 0, 1, 1], [], []>} : vector<8x32xf32>, vector<32x32xf32>, vector<8x32xf32> -> vector<8x32xf32>
    %c0_108 = arith.constant 0 : index
    %c0_109 = arith.constant 0 : index
    %191 = vector.load %arg20[%c0_108, %c0_109] : memref<1x32xf32, #tpu.memory_space<vmem>>, vector<1x32xf32>
    %192 = vector.broadcast %191 : vector<1x32xf32> to vector<8x32xf32>
    %193 = arith.addf %190, %192 : vector<8x32xf32>
    %194 = arith.addf %168, %193 : vector<8x32xf32>
    %cst_110 = arith.constant 0.707106769 : f32
    %195 = vector.broadcast %cst_110 : f32 to vector<8x32xf32>
    %196 = arith.mulf %194, %195 : vector<8x32xf32>
    %197 = arith.addf %196, %121 : vector<8x32xf32>
    %cst_111 = arith.constant 0.707106769 : f32
    %198 = vector.broadcast %cst_111 : f32 to vector<8x32xf32>
    %199 = arith.mulf %197, %198 : vector<8x32xf32>
    %c2_i32_112 = arith.constant 2 : i32
    %200 = tpu.dynamic_rotate %199 by %c2_i32_112 dim 0 : vector<8x32xf32>, i32 -> vector<8x32xf32>
    %201 = tpu.iota {dimensions = array<i32: 0>} : vector<8x32xi32>
    %c-2_i32_113 = arith.constant -2 : i32
    %202 = vector.broadcast %c-2_i32_113 : i32 to vector<8x32xi32>
    %203 = arith.addi %201, %202 : vector<8x32xi32>
    %c0_i32_114 = arith.constant 0 : i32
    %204 = vector.broadcast %c0_i32_114 : i32 to vector<8x32xi32>
    %205 = arith.cmpi sge, %203, %204 : vector<8x32xi32>
    %c-2_i32_115 = arith.constant -2 : i32
    %206 = vector.broadcast %c-2_i32_115 : i32 to vector<8x32xi32>
    %207 = arith.addi %201, %206 : vector<8x32xi32>
    %c8_i32_116 = arith.constant 8 : i32
    %208 = vector.broadcast %c8_i32_116 : i32 to vector<8x32xi32>
    %209 = arith.cmpi slt, %207, %208 : vector<8x32xi32>
    %210 = arith.andi %205, %209 : vector<8x32xi1>
    %cst_117 = arith.constant 1.000000e+00 : f32
    %211 = vector.broadcast %cst_117 : f32 to vector<8x32xf32>
    %212 = arith.select %210, %200, %211 : vector<8x32xi1>, vector<8x32xf32>
    %c1_i32_118 = arith.constant 1 : i32
    %213 = tpu.dynamic_rotate %199 by %c1_i32_118 dim 0 : vector<8x32xf32>, i32 -> vector<8x32xf32>
    %214 = tpu.iota {dimensions = array<i32: 0>} : vector<8x32xi32>
    %c-1_i32_119 = arith.constant -1 : i32
    %215 = vector.broadcast %c-1_i32_119 : i32 to vector<8x32xi32>
    %216 = arith.addi %214, %215 : vector<8x32xi32>
    %c0_i32_120 = arith.constant 0 : i32
    %217 = vector.broadcast %c0_i32_120 : i32 to vector<8x32xi32>
    %218 = arith.cmpi sge, %216, %217 : vector<8x32xi32>
    %c-1_i32_121 = arith.constant -1 : i32
    %219 = vector.broadcast %c-1_i32_121 : i32 to vector<8x32xi32>
    %220 = arith.addi %214, %219 : vector<8x32xi32>
    %c8_i32_122 = arith.constant 8 : i32
    %221 = vector.broadcast %c8_i32_122 : i32 to vector<8x32xi32>
    %222 = arith.cmpi slt, %220, %221 : vector<8x32xi32>
    %223 = arith.andi %218, %222 : vector<8x32xi1>
    %cst_123 = arith.constant 1.000000e+00 : f32
    %224 = vector.broadcast %cst_123 : f32 to vector<8x32xf32>
    %225 = arith.select %223, %213, %224 : vector<8x32xi1>, vector<8x32xf32>
    %226 = tpu.concatenate %212, %225, %199 in 1 : vector<8x32xf32>, vector<8x32xf32>, vector<8x32xf32> -> vector<8x96xf32>
    %c1_124 = arith.constant 1 : index
    %c0_125 = arith.constant 0 : index
    %c0_126 = arith.constant 0 : index
    %227 = vector.load %arg13[%c1_124, %c0_125, %c0_126] : memref<2x96x32xf32, #tpu.memory_space<vmem>>, vector<1x96x32xf32>
    %228 = vector.shape_cast %227 : vector<1x96x32xf32> to vector<96x32xf32>
    %c1_127 = arith.constant 1 : index
    %c0_128 = arith.constant 0 : index
    %c0_129 = arith.constant 0 : index
    %229 = vector.load %arg15[%c1_127, %c0_128, %c0_129] : memref<2x1x32xf32, #tpu.memory_space<vmem>>, vector<1x1x32xf32>
    %230 = vector.shape_cast %229 : vector<1x1x32xf32> to vector<1x32xf32>
    %c1_130 = arith.constant 1 : index
    %c0_131 = arith.constant 0 : index
    %c0_132 = arith.constant 0 : index
    %231 = vector.load %arg14[%c1_130, %c0_131, %c0_132] : memref<2x96x32xf32, #tpu.memory_space<vmem>>, vector<1x96x32xf32>
    %232 = vector.shape_cast %231 : vector<1x96x32xf32> to vector<96x32xf32>
    %c1_133 = arith.constant 1 : index
    %c0_134 = arith.constant 0 : index
    %c0_135 = arith.constant 0 : index
    %233 = vector.load %arg16[%c1_133, %c0_134, %c0_135] : memref<2x1x32xf32, #tpu.memory_space<vmem>>, vector<1x1x32xf32>
    %234 = vector.shape_cast %233 : vector<1x1x32xf32> to vector<1x32xf32>
    %cst_136 = arith.constant dense<0.000000e+00> : vector<8x32xf32>
    %235 = tpu.matmul %226, %228, %cst_136 {dimension_numbers = #tpu.dot_dimension_numbers<[1], [0], [0], [1], [0, 0, 1, 1], [], []>} : vector<8x96xf32>, vector<96x32xf32>, vector<8x32xf32> -> vector<8x32xf32>
    %236 = vector.broadcast %230 : vector<1x32xf32> to vector<8x32xf32>
    %237 = arith.addf %235, %236 : vector<8x32xf32>
    %cst_137 = arith.constant dense<0.000000e+00> : vector<8x32xf32>
    %238 = tpu.matmul %226, %232, %cst_137 {dimension_numbers = #tpu.dot_dimension_numbers<[1], [0], [0], [1], [0, 0, 1, 1], [], []>} : vector<8x96xf32>, vector<96x32xf32>, vector<8x32xf32> -> vector<8x32xf32>
    %239 = vector.broadcast %234 : vector<1x32xf32> to vector<8x32xf32>
    %240 = arith.addf %238, %239 : vector<8x32xf32>
    %241 = arith.negf %240 : vector<8x32xf32>
    %242 = math.exp %241 : vector<8x32xf32>
    %cst_138 = arith.constant 1.000000e+00 : f32
    %243 = vector.broadcast %cst_138 : f32 to vector<8x32xf32>
    %244 = arith.addf %243, %242 : vector<8x32xf32>
    %245 = arith.divf %243, %244 : vector<8x32xf32>
    %246 = arith.mulf %237, %245 : vector<8x32xf32>
    %c0_139 = arith.constant 0 : index
    %c0_140 = arith.constant 0 : index
    %247 = vector.load %arg17[%c0_139, %c0_140] : memref<32x32xf32, #tpu.memory_space<vmem>>, vector<32x32xf32>
    %cst_141 = arith.constant dense<0.000000e+00> : vector<8x32xf32>
    %248 = tpu.matmul %246, %247, %cst_141 {dimension_numbers = #tpu.dot_dimension_numbers<[1], [0], [0], [1], [0, 0, 1, 1], [], []>} : vector<8x32xf32>, vector<32x32xf32>, vector<8x32xf32> -> vector<8x32xf32>
    %c0_142 = arith.constant 0 : index
    %c0_143 = arith.constant 0 : index
    %249 = vector.load %arg18[%c0_142, %c0_143] : memref<1x32xf32, #tpu.memory_space<vmem>>, vector<1x32xf32>
    %250 = vector.broadcast %249 : vector<1x32xf32> to vector<8x32xf32>
    %251 = arith.addf %248, %250 : vector<8x32xf32>
    %252 = arith.addf %251, %3 : vector<8x32xf32>
    %cst_144 = arith.constant 0.707106769 : f32
    %253 = vector.broadcast %cst_144 : f32 to vector<8x32xf32>
    %254 = arith.mulf %252, %253 : vector<8x32xf32>
    %cst_145 = arith.constant dense<0.000000e+00> : vector<8x8xf32>
    %255 = tpu.matmul %254, %113, %cst_145 {dimension_numbers = #tpu.dot_dimension_numbers<[1], [1], [0], [0], [0, 0, 1, 0], [], []>} : vector<8x32xf32>, vector<8x32xf32>, vector<8x8xf32> -> vector<8x8xf32>
    %cst_146 = arith.constant dense<0xFF800000> : vector<8xf32>
    %256 = vector.multi_reduction <maximumf>, %255, %cst_146 [1] : vector<8x8xf32> to vector<8xf32>
    %257 = vector.shape_cast %256 : vector<8xf32> to vector<8x1xf32>
    %258 = vector.broadcast %257 : vector<8x1xf32> to vector<8x8xf32>
    %259 = arith.subf %255, %258 : vector<8x8xf32>
    %260 = math.exp %259 : vector<8x8xf32>
    %cst_147 = arith.constant dense<0.000000e+00> : vector<8xf32>
    %261 = vector.multi_reduction <add>, %260, %cst_147 [1] : vector<8x8xf32> to vector<8xf32>
    %262 = vector.shape_cast %261 : vector<8xf32> to vector<8x1xf32>
    %263 = tpu.reciprocal %262 {approx = true} : vector<8x1xf32> -> vector<8x1xf32>
    %264 = vector.broadcast %263 : vector<8x1xf32> to vector<8x8xf32>
    %265 = arith.mulf %260, %264 : vector<8x8xf32>
    %cst_148 = arith.constant dense<0.000000e+00> : vector<8x32xf32>
    %266 = tpu.matmul %265, %116, %cst_148 {dimension_numbers = #tpu.dot_dimension_numbers<[1], [0], [0], [1], [0, 0, 1, 1], [], []>} : vector<8x8xf32>, vector<8x32xf32>, vector<8x32xf32> -> vector<8x32xf32>
    %c0_149 = arith.constant 0 : index
    %c0_150 = arith.constant 0 : index
    %267 = vector.load %arg19[%c0_149, %c0_150] : memref<32x32xf32, #tpu.memory_space<vmem>>, vector<32x32xf32>
    %cst_151 = arith.constant dense<0.000000e+00> : vector<8x32xf32>
    %268 = tpu.matmul %266, %267, %cst_151 {dimension_numbers = #tpu.dot_dimension_numbers<[1], [0], [0], [1], [0, 0, 1, 1], [], []>} : vector<8x32xf32>, vector<32x32xf32>, vector<8x32xf32> -> vector<8x32xf32>
    %c0_152 = arith.constant 0 : index
    %c0_153 = arith.constant 0 : index
    %269 = vector.load %arg20[%c0_152, %c0_153] : memref<1x32xf32, #tpu.memory_space<vmem>>, vector<1x32xf32>
    %270 = vector.broadcast %269 : vector<1x32xf32> to vector<8x32xf32>
    %271 = arith.addf %268, %270 : vector<8x32xf32>
    %272 = arith.addf %246, %271 : vector<8x32xf32>
    %cst_154 = arith.constant 0.707106769 : f32
    %273 = vector.broadcast %cst_154 : f32 to vector<8x32xf32>
    %274 = arith.mulf %272, %273 : vector<8x32xf32>
    %275 = arith.addf %274, %199 : vector<8x32xf32>
    %cst_155 = arith.constant 0.707106769 : f32
    %276 = vector.broadcast %cst_155 : f32 to vector<8x32xf32>
    %277 = arith.mulf %275, %276 : vector<8x32xf32>
    %c0_156 = arith.constant 0 : index
    %c0_157 = arith.constant 0 : index
    %278 = vector.load %arg21[%c0_156, %c0_157] : memref<32x32xf32, #tpu.memory_space<vmem>>, vector<32x32xf32>
    %cst_158 = arith.constant dense<0.000000e+00> : vector<8x32xf32>
    %279 = tpu.matmul %277, %278, %cst_158 {dimension_numbers = #tpu.dot_dimension_numbers<[1], [0], [0], [1], [0, 0, 1, 1], [], []>} : vector<8x32xf32>, vector<32x32xf32>, vector<8x32xf32> -> vector<8x32xf32>
    %c0_159 = arith.constant 0 : index
    %c0_160 = arith.constant 0 : index
    %280 = vector.load %arg22[%c0_159, %c0_160] : memref<1x32xf32, #tpu.memory_space<vmem>>, vector<1x32xf32>
    %281 = vector.broadcast %280 : vector<1x32xf32> to vector<8x32xf32>
    %282 = arith.addf %279, %281 : vector<8x32xf32>
    %c0_161 = arith.constant 0 : index
    %c0_162 = arith.constant 0 : index
    %283 = vector.load %arg23[%c0_161, %c0_162] : memref<32x128xf32, #tpu.memory_space<vmem>>, vector<32x128xf32>
    %cst_163 = arith.constant dense<0.000000e+00> : vector<8x128xf32>
    %284 = tpu.matmul %282, %283, %cst_163 {dimension_numbers = #tpu.dot_dimension_numbers<[1], [0], [0], [1], [0, 0, 1, 1], [], []>} : vector<8x32xf32>, vector<32x128xf32>, vector<8x128xf32> -> vector<8x128xf32>
    %c0_164 = arith.constant 0 : index
    %c0_165 = arith.constant 0 : index
    %285 = vector.load %arg24[%c0_164, %c0_165] : memref<1x128xf32, #tpu.memory_space<vmem>>, vector<1x128xf32>
    %286 = vector.broadcast %285 : vector<1x128xf32> to vector<8x128xf32>
    %287 = arith.addf %284, %286 : vector<8x128xf32>
    %c0_166 = arith.constant 0 : index
    %c0_167 = arith.constant 0 : index
    %c0_168 = arith.constant 0 : index
    %288 = vector.load %arg25[%c0_166, %c0_167, %c0_168] : memref<1x8x128xf32, #tpu.memory_space<vmem>>, vector<1x8x128xf32>
    %289 = vector.shape_cast %288 : vector<1x8x128xf32> to vector<8x128xf32>
    %290 = vector.shape_cast %287 : vector<8x128xf32> to vector<1x8x128xf32>
    tpu.vector_store %arg25[%c0_166, %c0_167, %c0_168], %290 {strides = array<i32>} : memref<1x8x128xf32, #tpu.memory_space<vmem>>, vector<1x8x128xf32>,
    %c0_169 = arith.constant 0 : index
    %c0_170 = arith.constant 0 : index
    %c0_171 = arith.constant 0 : index
    %291 = vector.load %arg26[%c0_169, %c0_170, %c0_171] : memref<1x8x8xf32, #tpu.memory_space<vmem>>, vector<1x8x8xf32>
    %292 = vector.shape_cast %291 : vector<1x8x8xf32> to vector<8x8xf32>
    %293 = vector.shape_cast %265 : vector<8x8xf32> to vector<1x8x8xf32>
    tpu.vector_store %arg26[%c0_169, %c0_170, %c0_171], %293 {strides = array<i32>} : memref<1x8x8xf32, #tpu.memory_space<vmem>>, vector<1x8x8xf32>,
    return
  }
  func.func @transform_0(%arg0: i32) -> (i32, i32, i32) {
    %c0_i32 = arith.constant 0 : i32
    %c0_i32_0 = arith.constant 0 : i32
    %c0_i32_1 = arith.constant 0 : i32
    return %arg0, %c0_i32, %c0_i32_0 : i32, i32, i32
  }
  func.func @transform_1(%arg0: i32) -> (i32, i32, i32) {
    %c0_i32 = arith.constant 0 : i32
    %c0_i32_0 = arith.constant 0 : i32
    %c0_i32_1 = arith.constant 0 : i32
    return %arg0, %c0_i32, %c0_i32_0 : i32, i32, i32
  }
  func.func @transform_2(%arg0: i32) -> (i32, i32) {
    %c0_i32 = arith.constant 0 : i32
    %c0_i32_0 = arith.constant 0 : i32
    %c0_i32_1 = arith.constant 0 : i32
    return %c0_i32, %c0_i32_0 : i32, i32
  }
  func.func @transform_3(%arg0: i32) -> (i32, i32) {
    %c0_i32 = arith.constant 0 : i32
    %c0_i32_0 = arith.constant 0 : i32
    %c0_i32_1 = arith.constant 0 : i32
    return %c0_i32, %c0_i32_0 : i32, i32
  }
  func.func @transform_4(%arg0: i32) -> (i32, i32, i32) {
    %c0_i32 = arith.constant 0 : i32
    %c0_i32_0 = arith.constant 0 : i32
    %c0_i32_1 = arith.constant 0 : i32
    %c0_i32_2 = arith.constant 0 : i32
    return %c0_i32, %c0_i32_0, %c0_i32_1 : i32, i32, i32
  }
  func.func @transform_5(%arg0: i32) -> (i32, i32, i32) {
    %c0_i32 = arith.constant 0 : i32
    %c0_i32_0 = arith.constant 0 : i32
    %c0_i32_1 = arith.constant 0 : i32
    %c0_i32_2 = arith.constant 0 : i32
    return %c0_i32, %c0_i32_0, %c0_i32_1 : i32, i32, i32
  }
  func.func @transform_6(%arg0: i32) -> (i32, i32, i32) {
    %c0_i32 = arith.constant 0 : i32
    %c0_i32_0 = arith.constant 0 : i32
    %c0_i32_1 = arith.constant 0 : i32
    %c0_i32_2 = arith.constant 0 : i32
    return %c0_i32, %c0_i32_0, %c0_i32_1 : i32, i32, i32
  }
  func.func @transform_7(%arg0: i32) -> (i32, i32, i32) {
    %c0_i32 = arith.constant 0 : i32
    %c0_i32_0 = arith.constant 0 : i32
    %c0_i32_1 = arith.constant 0 : i32
    %c0_i32_2 = arith.constant 0 : i32
    return %c0_i32, %c0_i32_0, %c0_i32_1 : i32, i32, i32
  }
  func.func @transform_8(%arg0: i32) -> (i32, i32) {
    %c0_i32 = arith.constant 0 : i32
    %c0_i32_0 = arith.constant 0 : i32
    %c0_i32_1 = arith.constant 0 : i32
    return %c0_i32, %c0_i32_0 : i32, i32
  }
  func.func @transform_9(%arg0: i32) -> (i32, i32) {
    %c0_i32 = arith.constant 0 : i32
    %c0_i32_0 = arith.constant 0 : i32
    %c0_i32_1 = arith.constant 0 : i32
    return %c0_i32, %c0_i32_0 : i32, i32
  }
  func.func @transform_10(%arg0: i32) -> (i32, i32) {
    %c0_i32 = arith.constant 0 : i32
    %c0_i32_0 = arith.constant 0 : i32
    %c0_i32_1 = arith.constant 0 : i32
    return %c0_i32, %c0_i32_0 : i32, i32
  }
  func.func @transform_11(%arg0: i32) -> (i32, i32) {
    %c0_i32 = arith.constant 0 : i32
    %c0_i32_0 = arith.constant 0 : i32
    %c0_i32_1 = arith.constant 0 : i32
    return %c0_i32, %c0_i32_0 : i32, i32
  }
  func.func @transform_12(%arg0: i32) -> (i32, i32, i32) {
    %c0_i32 = arith.constant 0 : i32
    %c0_i32_0 = arith.constant 0 : i32
    %c0_i32_1 = arith.constant 0 : i32
    %c0_i32_2 = arith.constant 0 : i32
    return %c0_i32, %c0_i32_0, %c0_i32_1 : i32, i32, i32
  }
  func.func @transform_13(%arg0: i32) -> (i32, i32, i32) {
    %c0_i32 = arith.constant 0 : i32
    %c0_i32_0 = arith.constant 0 : i32
    %c0_i32_1 = arith.constant 0 : i32
    %c0_i32_2 = arith.constant 0 : i32
    return %c0_i32, %c0_i32_0, %c0_i32_1 : i32, i32, i32
  }
  func.func @transform_14(%arg0: i32) -> (i32, i32, i32) {
    %c0_i32 = arith.constant 0 : i32
    %c0_i32_0 = arith.constant 0 : i32
    %c0_i32_1 = arith.constant 0 : i32
    %c0_i32_2 = arith.constant 0 : i32
    return %c0_i32, %c0_i32_0, %c0_i32_1 : i32, i32, i32
  }
  func.func @transform_15(%arg0: i32) -> (i32, i32, i32) {
    %c0_i32 = arith.constant 0 : i32
    %c0_i32_0 = arith.constant 0 : i32
    %c0_i32_1 = arith.constant 0 : i32
    %c0_i32_2 = arith.constant 0 : i32
    return %c0_i32, %c0_i32_0, %c0_i32_1 : i32, i32, i32
  }
  func.func @transform_16(%arg0: i32) -> (i32, i32) {
    %c0_i32 = arith.constant 0 : i32
    %c0_i32_0 = arith.constant 0 : i32
    %c0_i32_1 = arith.constant 0 : i32
    return %c0_i32, %c0_i32_0 : i32, i32
  }
  func.func @transform_17(%arg0: i32) -> (i32, i32) {
    %c0_i32 = arith.constant 0 : i32
    %c0_i32_0 = arith.constant 0 : i32
    %c0_i32_1 = arith.constant 0 : i32
    return %c0_i32, %c0_i32_0 : i32, i32
  }
  func.func @transform_18(%arg0: i32) -> (i32, i32) {
    %c0_i32 = arith.constant 0 : i32
    %c0_i32_0 = arith.constant 0 : i32
    %c0_i32_1 = arith.constant 0 : i32
    return %c0_i32, %c0_i32_0 : i32, i32
  }
  func.func @transform_19(%arg0: i32) -> (i32, i32) {
    %c0_i32 = arith.constant 0 : i32
    %c0_i32_0 = arith.constant 0 : i32
    %c0_i32_1 = arith.constant 0 : i32
    return %c0_i32, %c0_i32_0 : i32, i32
  }
  func.func @transform_20(%arg0: i32) -> (i32, i32) {
    %c0_i32 = arith.constant 0 : i32
    %c0_i32_0 = arith.constant 0 : i32
    %c0_i32_1 = arith.constant 0 : i32
    return %c0_i32, %c0_i32_0 : i32, i32
  }
  func.func @transform_21(%arg0: i32) -> (i32, i32) {
    %c0_i32 = arith.constant 0 : i32
    %c0_i32_0 = arith.constant 0 : i32
    %c0_i32_1 = arith.constant 0 : i32
    return %c0_i32, %c0_i32_0 : i32, i32
  }
  func.func @transform_22(%arg0: i32) -> (i32, i32) {
    %c0_i32 = arith.constant 0 : i32
    %c0_i32_0 = arith.constant 0 : i32
    %c0_i32_1 = arith.constant 0 : i32
    return %c0_i32, %c0_i32_0 : i32, i32
  }
  func.func @transform_23(%arg0: i32) -> (i32, i32) {
    %c0_i32 = arith.constant 0 : i32
    %c0_i32_0 = arith.constant 0 : i32
    %c0_i32_1 = arith.constant 0 : i32
    return %c0_i32, %c0_i32_0 : i32, i32
  }
  func.func @transform_24(%arg0: i32) -> (i32, i32, i32) {
    %c0_i32 = arith.constant 0 : i32
    %c0_i32_0 = arith.constant 0 : i32
    %c0_i32_1 = arith.constant 0 : i32
    return %arg0, %c0_i32, %c0_i32_0 : i32, i32, i32
  }
  func.func @transform_25(%arg0: i32) -> (i32, i32, i32) {
    %c0_i32 = arith.constant 0 : i32
    %c0_i32_0 = arith.constant 0 : i32
    %c0_i32_1 = arith.constant 0 : i32
    return %arg0, %c0_i32, %c0_i32_0 : i32, i32, i32
  }
}

</mosaic_0001>

<bundles_post_ra>
// kernel: seq2seq_forward.1
= control target key start
LH: loop header
LB: loop body
LE: loop exit
PB: predicated region body
PF: predicated region fallthrough
CT: control target
= control target key end

     0   :  { %s4756_s0 = inlined_call_operand.vmem [shape: f32[2,8,32], index: 0, kind: input, shape index: {}]   ;;  %s4757_s1 = inlined_call_operand.vmem [shape: f32[2,8,32], index: 1, kind: input, shape index: {}]   ;;  %s4758_s2 = inlined_call_operand.vmem [shape: f32[32,32], index: 2, kind: input, shape index: {}]   ;;  %s4759_s3 = inlined_call_operand.vmem [shape: f32[1,32], index: 3, kind: input, shape index: {}]   ;;  %s4760_s4 = inlined_call_operand.vmem [shape: f32[2,96,32], index: 4, kind: input, shape index: {}]   ;;  %s4761_s5 = inlined_call_operand.vmem [shape: f32[2,96,32], index: 5, kind: input, shape index: {}]   ;;  %s4762_s6 = inlined_call_operand.vmem [shape: f32[2,1,32], index: 6, kind: input, shape index: {}]   ;;  %s4763_s7 = inlined_call_operand.vmem [shape: f32[2,1,32], index: 7, kind: input, shape index: {}]   ;;  %s4764_s8 = inlined_call_operand.vmem [shape: f32[32,32], index: 8, kind: input, shape index: {}]   ;;  %s4765_s9 = inlined_call_operand.vmem [shape: f32[1,32], index: 9, kind: input, shape index: {}]   ;;  %s4766_s10 = inlined_call_operand.vmem [shape: f32[32,32], index: 10, kind: input, shape index: {}]   ;;  %s4767_s11 = inlined_call_operand.vmem [shape: f32[1,32], index: 11, kind: input, shape index: {}]   ;;  %s4768_s12 = inlined_call_operand.vmem [shape: f32[2,96,32], index: 12, kind: input, shape index: {}]   ;;  %s4769_s13 = inlined_call_operand.vmem [shape: f32[2,96,32], index: 13, kind: input, shape index: {}]   ;;  %s4770_s14 = inlined_call_operand.vmem [shape: f32[2,1,32], index: 14, kind: input, shape index: {}]   ;;  %s4771_s15 = inlined_call_operand.vmem [shape: f32[2,1,32], index: 15, kind: input, shape index: {}]   ;;  %s4772_s16 = inlined_call_operand.vmem [shape: f32[32,32], index: 16, kind: input, shape index: {}]   ;;  %s4773_s17 = inlined_call_operand.vmem [shape: f32[1,32], index: 17, kind: input, shape index: {}]   ;;  %s4774_s18 = inlined_call_operand.vmem [shape: f32[32,32], index: 18, kind: input, shape index: {}]   ;;  %s4775_s19 = inlined_call_operand.vmem [shape: f32[1,32], index: 19, kind: input, shape index: {}]   ;;  %s4776_s20 = inlined_call_operand.vmem [shape: f32[32,32], index: 20, kind: input, shape index: {}]   ;;  %s4777_s21 = inlined_call_operand.vmem [shape: f32[1,32], index: 21, kind: input, shape index: {}]   ;;  %s4778_s22 = inlined_call_operand.vmem [shape: f32[32,128], index: 22, kind: input, shape index: {}]   ;;  %s4779_s23 = inlined_call_operand.vmem [shape: f32[1,128], index: 23, kind: input, shape index: {}]   ;;  %s4780_s24 = inlined_call_operand.hbm [shape: f32[2,8,128], index: 24, kind: output, shape index: {0}]   ;;  %s4781_s25 = inlined_call_operand.hbm [shape: f32[2,8,8], index: 25, kind: output, shape index: {1}]  }
   0x1   :  { %4806 = sst [smem:[#allocation14_spill]] %s4756_s0 }
   0x2   :  { %4807 = sst [smem:[#allocation15_spill]] %s4757_s1 }
   0x3   :  { %4808 = sst [smem:[#allocation16_spill]] %s4758_s2 }
   0x4   :  { %4809 = sst [smem:[#allocation17_spill]] %s4759_s3 }
   0x5   :  { %4810 = sst [smem:[#allocation18_spill]] %s4760_s4 }
   0x6   :  { %4811 = sst [smem:[#allocation19_spill]] %s4761_s5 }
   0x7   :  { %4812 = sst [smem:[#allocation20_spill]] %s4762_s6 }
   0x8   :  { %4813 = sst [smem:[#allocation21_spill]] %s4763_s7 }
   0x9   :  { %4814 = sst [smem:[#allocation22_spill]] %s4764_s8 }
   0xa   :  { %4815 = sst [smem:[#allocation23_spill]] %s4765_s9 }
   0xb   :  { %4816 = sst [smem:[#allocation24_spill]] %s4766_s10 }
   0xc   :  { %4817 = sst [smem:[#allocation25_spill]] %s4767_s11 }
   0xd   :  { %4818 = sst [smem:[#allocation26_spill]] %s4768_s12 }
   0xe   :  { %4819 = sst [smem:[#allocation27_spill]] %s4769_s13 }
   0xf   :  { %4820 = sst [smem:[#allocation28_spill]] %s4779_s23 }
  0x10   :  { %4821 = sst [smem:[#allocation29_spill]] %s4780_s24 }
  0x11   :  { %4822 = sst [smem:[#allocation30_spill]] %s4781_s25 }
  0x12   :  { %31 = vsyncpa [#allocation3], 0 }
  0x13   :  { %33 = vsyncpa [#allocation3 + $0x1], 0 }
  0x14   :  { %34 = vsyncpa [#allocation5], 0 }
  0x15   :  { %36 = vsyncpa [#allocation5 + $0x1], 0  ;;  %s3934_s29 = smov 0   ;;  %s3936_s2 = smov 0  }
  0x16   :  { %s3938_s6 = smov 0   ;;  %s3940_s30 = smov 0  }
  0x17 LB: > { %4823 = sst [smem:[#allocation8_spill]] %s3783_s29  ;;  %s3955_s7 = sadd.s32 4294967295, %s3795_s30   ;;  %s3795_s30 = sphi %s3940_s30, %s4856_s30   ;;  %s3791_s6 = sphi %s3938_s6, %s4858_s6   ;;  %s3787_s2 = sphi %s3936_s2, %s4860_s2   ;;  %s3783_s29 = sphi %s3934_s29, %s4859_s29  }
  0x18   : > { %4824 = sst [smem:[#allocation9_spill]] %s3791_s6  ;;  %s2830_s3 = sadd.s32 4294967294, %s3795_s30  }
  0x19   : > { %4825 = sst [smem:[#allocation10_spill]] %s3795_s30  ;;  %s3959_s26 = sadd.s32 1, %s3795_s30  }
  0x1a   : > { %4826 = sst [smem:[#allocation11_spill]] %s3959_s26  ;;  %s563_s1 = sadd.s32 1, %s3791_s6 }
  0x1b   : > { %s560_s8 = ssub.s32 %s3795_s30, %s3959_s26  ;;  %p573_p0 = scmp.ne.s32.totalorder %s3791_s6, %s3787_s2 }
  0x1c   : > { %p561_p1 = scmp.eq.s32.totalorder %s560_s8, 0  ;;  %p574_p2 = scmp.eq.s32.totalorder %s3955_s7, 1 }
  0x1d   : > { %p579_p3 = scmp.ne.s32.totalorder %s3787_s2, %s3783_s29  ;;  %p580_p4 = scmp.eq.s32.totalorder %s2830_s3, 1 }
  0x1e   : > { %s3970_s27 = scalar_select %p561_p1, %s3791_s6, %s563_s1  }
  0x1f   : > { %p3972_p5 = por %p574_p2, %p573_p0  ;;  %p3976_p6 = por %p580_p4, %p579_p3 }
  0x20   : > { %4827 = sst [smem:[#allocation12_spill]] %s3970_s27  ;;  %p2833_p7 = scmp.ge.s32.totalorder %s3795_s30, 1 }
  0x21   : > { %s4829_s28 = scalar_select %p3976_p6, 1, 0 }
  0x22   : > { %p704_p8 = scmp.lt.s32.totalorder %s3795_s30, 3 }
  0x23   : > { %4830 = sst [smem:[#allocation13_spill]] %s4829_s28 }
  0x24   : > { %p705_p9 = pnand %p2833_p7, %p704_p8 }
  0x25   : > { %s4831_s0 = sld [smem:[#allocation16_spill]] (!%p705_p9)  ;;  %v3797_v3 = vmov (!%p705_p9), 0.0|0.0   ;;  %vm3798_vm0 = vmmov (!%p705_p9), 0   ;;  %v3799_v6 = vmov (!%p705_p9), 0.0   ;;  %p780_p10 = scmp.lt.s32.totalorder (!%p705_p9), %s3955_s7, 1  ;;  %vm801_vm1 = vcmask (!%p705_p9), 261120  }
  0x26   : > { %708 = sbr.rel (%p705_p9) target bundleno = 4497 (0x1191), region = 116  ;;  %3430 = vmatprep.subr.bf16.mxu0 (!%p705_p9), %v3797_v3  ;;  %3103 = vmatprep.mubr.msk.f32.mxu0 (!%p705_p9), %vm3798_vm0, %v3799_v6  ;;  %s4832_s5 = sld [smem:[#allocation14_spill]] (!%p705_p9)  ;;  %v876_v42 = vlaneseq (!%p705_p9)  ;;  %vm898_vm4 = vcmask (!%p705_p9), 523264   ;;  %vm932_vm5 = vcmask (!%p705_p9), 785408   ;;  %vm1837_vm7 = vcmask (!%p705_p9), 64512  }
  0x27   : > { %3436 = vmatprep.subr.bf16.mxu1 (!%p705_p9), %v3797_v3  ;;  %3130 = vmatprep.mubr.msk.f32.mxu1 (!%p705_p9), %vm3798_vm0, %v3799_v6  ;;  %s4835_s30 = sld [smem:[#allocation17_spill]] (!%p705_p9)  ;;  %s4799_s23 = smov (!%p705_p9), 32  }
  0x28   : > { %v4101_v46 = vshrl.u32 (!%p705_p9), %v876_v42, 7  ;;  %s4836_s24 = sld [smem:[#allocation21_spill]] (!%p705_p9)  ;;  %s4837_s25 = sld [smem:[#allocation20_spill]] (!%p705_p9) }
  0x29   : > { %s4839_s9 = smov (!%p705_p9), 64   ;;  %s4840_s10 = sld [smem:[#allocation24_spill]] (!%p705_p9) }
  0x2a   : > { %v4108_v48 = vadd.s32 (!%p705_p9), 1, %v4101_v46  ;;  %v4120_v54 = vadd.s32 (!%p705_p9), 4294967295, %v4101_v46  ;;  %s4842_s28 = sld [smem:[#allocation15_spill]] (!%p705_p9)  ;;  %s4844_s13 = sld [smem:[#allocation27_spill]] (!%p705_p9) }
  0x2b   : > { %v790_v0 = vld [vmem:[%s4831_s0] sm:$0xff] (!%p705_p9)  ;;  %v791_v1 = vld [vmem:[%s4831_s0 + $0x8] sm:$0xff] (!%p705_p9)  ;;  %v792_v2 = vld [vmem:[%s4831_s0 + $0x10] sm:$0xff] (!%p705_p9)  ;;  %s4845_s11 = sld [smem:[#allocation25_spill]] (!%p705_p9)  ;;  %s4846_s12 = sld [smem:[#allocation26_spill]] (!%p705_p9) }
  0x2c   : > { %v3431_v4 = vpack.c.bf16 (!%p705_p9), %v791_v1, %v790_v0  ;;  %v793_v5 = vld [vmem:[%s4831_s0 + $0x18] sm:$0xff] (!%p705_p9)  ;;  %s4833_s0 = sld [smem:[#allocation18_spill]] (!%p705_p9)  ;;  %vm886_vm2 = vcmp.lt.s32.totalorder (!%p705_p9), %v4108_v48, 8  ;;  %vm879_vm3 = vcmp.ge.s32.totalorder (!%p705_p9), %v4120_v54, 0  ;;  %v2920_v54 = vld [vmem:[%s4771_s15 + $0x1] ss:$0 sm:$0xff] (!%p705_p9) }
  0x2d   : > { %v3434_v7 = vpack.c.bf16 %v793_v5, %v792_v2  ;;  %s4002_s27 = scalar_select %p780_p10, %s3955_s7, 1  ;;  %v2838_v47 = vld [vmem:[%s4835_s30] ss:$0 sm:$0xff] }
  0x2e   : > { %3432 = vmatpush3.bf16.msra.mxu0 %v3431_v4  ;;  %s4838_s30 = smov 32   ;;  %s4848_s26 = sld [smem:[#allocation30_spill]] }
  0x2f   : > { %3433 = vmatprep.subr.bf16.mxu0 %v3797_v3  ;;  %s4794_s6 = sshll.u32 %s4002_s27, 3 }
  0x30   : > { %s783_s3 = scalar_lea.vmem %s4832_s5, %s4794_s6  ;;  %s4834_s5 = sld [smem:[#allocation19_spill]] }
  0x31   : > { %v4011_v8 = vld [vmem:[%s783_s3] sm:$0xff]  ;;  %s4797_s6 = smov 64   ;;  %s4841_s3 = sshll.u32 %s4002_s27, 3 }
  0x32   : > { %3435 = vmatpush3.bf16.msra.mxu0 %v3434_v7  ;;  %v900_v9 = vld [vmem:[%s4833_s0] sm:$0xff]  ;;  %v901_v10 = vld [vmem:[%s4833_s0 + $0x8] sm:$0xff]  ;;  %v902_v14 = vld [vmem:[%s4833_s0 + $0x10] sm:$0xff]  ;;  %s4628_s27 = sand.u32 1, %s3787_s2  }
  0x33   : > { %3454 = vmatprep.subr.bf16.mxu0 %v3797_v3  ;;  %v3437_v12 = vpack.c.bf16 %v901_v10, %v900_v9  ;;  %v903_v15 = vld [vmem:[%s4833_s0 + $0x18] sm:$0xff]  ;;  %v904_v21 = vld [vmem:[%s4833_s0 + $0x20] sm:$0xff]  ;;  %v905_v22 = vld [vmem:[%s4833_s0 + $0x28] sm:$0xff]  ;;  %s4804_s8 = sshll.u32 %s4628_s27, 3  ;;  %s2701_s29 = scalar_lea.sflag [#allocation5], %s4628_s27 }
  0x34   : > { %v3440_v19 = vpack.c.bf16 %v903_v15, %v902_v14  ;;  %v3443_v25 = vpack.c.bf16 %v905_v22, %v904_v21  ;;  %v906_v27 = vld [vmem:[%s4833_s0 + $0x30] sm:$0xff]  ;;  %v907_v28 = vld [vmem:[%s4833_s0 + $0x38] sm:$0xff]  ;;  %v908_v33 = vld [vmem:[%s4833_s0 + $0x40] sm:$0xff] }
  0x35   : > { %3104 = vmatmul.mubr.msk.f32.vlgmr.msra.gmra.mrb[0].mxu0 %vm801_vm1, %v4011_v8  ;;  %3438 = vmatpush3.bf16.msra.mxu1 %v3437_v12  ;;  %v3446_v31 = vpack.c.bf16 %v907_v28, %v906_v27  ;;  %v909_v34 = vld [vmem:[%s4833_s0 + $0x48] sm:$0xff]  ;;  %v910_v39 = vld [vmem:[%s4833_s0 + $0x50] sm:$0xff]  ;;  %v911_v40 = vld [vmem:[%s4833_s0 + $0x58] sm:$0xff] }
  0x36   : > { %3157 = vmatprep.mubr.msk.f32.mxu0 %vm3798_vm0, %v3799_v6  ;;  %v913_v11 = vld [vmem:[%s4834_s5] sm:$0xff]  ;;  %v914_v13 = vld [vmem:[%s4834_s5 + $0x8] sm:$0xff]  ;;  %v915_v17 = vld [vmem:[%s4834_s5 + $0x10] sm:$0xff]  ;;  %3439 = vmatprep.subr.bf16.mxu1 %v3797_v3  ;;  %v3449_v37 = vpack.c.bf16 %v909_v34, %v908_v33  ;;  %v3452_v43 = vpack.c.bf16 %v911_v40, %v910_v39 }
  0x37   : > { %v3455_v16 = vpack.c.bf16 %v914_v13, %v913_v11  ;;  %v916_v18 = vld [vmem:[%s4834_s5 + $0x18] sm:$0xff]  ;;  %v917_v23 = vld [vmem:[%s4834_s5 + $0x20] sm:$0xff]  ;;  %v918_v24 = vld [vmem:[%s4834_s5 + $0x28] sm:$0xff] }
  0x38   : > { %v3458_v20 = vpack.c.bf16 %v916_v18, %v915_v17  ;;  %v3461_v26 = vpack.c.bf16 %v918_v24, %v917_v23  ;;  %v919_v29 = vld [vmem:[%s4834_s5 + $0x30] sm:$0xff]  ;;  %v920_v30 = vld [vmem:[%s4834_s5 + $0x38] sm:$0xff]  ;;  %v921_v35 = vld [vmem:[%s4834_s5 + $0x40] sm:$0xff] }
  0x39   : > { %3456 = vmatpush3.bf16.msra.mxu0 %v3455_v16  ;;  %3441 = vmatpush3.bf16.msra.mxu1 %v3440_v19  ;;  %v3464_v32 = vpack.c.bf16 %v920_v30, %v919_v29  ;;  %v922_v36 = vld [vmem:[%s4834_s5 + $0x48] sm:$0xff]  ;;  %v923_v41 = vld [vmem:[%s4834_s5 + $0x50] sm:$0xff]  ;;  %v924_v44 = vld [vmem:[%s4834_s5 + $0x58] sm:$0xff] }
  0x3a   : > { %3457 = vmatprep.subr.bf16.mxu0 %v3797_v3  ;;  %3442 = vmatprep.subr.bf16.mxu1 %v3797_v3  ;;  %v3467_v38 = vpack.c.bf16 %v922_v36, %v921_v35  ;;  %v3470_v45 = vpack.c.bf16 %v924_v44, %v923_v41  ;;  %v2858_v61 = vld [vmem:[%s4834_s5 + $0x60] sm:$0xff]  ;;  %v2859_v62 = vld [vmem:[%s4834_s5 + $0x68] sm:$0xff]  ;;  %v2860_v2 = vld [vmem:[%s4834_s5 + $0x70] sm:$0xff] }
  0x3b   : > { %v2845_v63 = vld [vmem:[%s4833_s0 + $0x60] sm:$0xff]  ;;  %v3491_v0 = vpack.c.bf16 %v2859_v62, %v2858_v61  ;;  %v2846_v1 = vld [vmem:[%s4833_s0 + $0x68] sm:$0xff]  ;;  %v2861_v4 = vld [vmem:[%s4834_s5 + $0x78] sm:$0xff] }
  0x3c   : > { %v3473_v5 = vpack.c.bf16 %v2846_v1, %v2845_v63  ;;  %v2847_v7 = vld [vmem:[%s4833_s0 + $0x70] sm:$0xff]  ;;  %v2848_v9 = vld [vmem:[%s4833_s0 + $0x78] sm:$0xff]  ;;  %v3494_v10 = vpack.c.bf16 %v2861_v4, %v2860_v2  ;;  %v2862_v12 = vld [vmem:[%s4834_s5 + $0x80] sm:$0xff] }
  0x3d   : > { %3459 = vmatpush3.bf16.msra.mxu0 %v3458_v20  ;;  %3444 = vmatpush3.bf16.msra.mxu1 %v3443_v25  ;;  %v3476_v11 = vpack.c.bf16 %v2848_v9, %v2847_v7  ;;  %v2863_v13 = vld [vmem:[%s4834_s5 + $0x88] sm:$0xff]  ;;  %v2849_v14 = vld [vmem:[%s4833_s0 + $0x80] sm:$0xff]  ;;  %v2864_v18 = vld [vmem:[%s4834_s5 + $0x90] sm:$0xff] }
  0x3e   : > { %3460 = vmatprep.subr.bf16.mxu0 %v3797_v3  ;;  %3445 = vmatprep.subr.bf16.mxu1 %v3797_v3  ;;  %v2850_v15 = vld [vmem:[%s4833_s0 + $0x88] sm:$0xff]  ;;  %v3497_v16 = vpack.c.bf16 %v2863_v13, %v2862_v12  ;;  %v2865_v19 = vld [vmem:[%s4834_s5 + $0x98] sm:$0xff]  ;;  %v2851_v20 = vld [vmem:[%s4833_s0 + $0x90] sm:$0xff] }
  0x3f   : > { %v3479_v17 = vpack.c.bf16 %v2850_v15, %v2849_v14  ;;  %v2852_v21 = vld [vmem:[%s4833_s0 + $0x98] sm:$0xff]  ;;  %v3500_v22 = vpack.c.bf16 %v2865_v19, %v2864_v18  ;;  %v2866_v24 = vld [vmem:[%s4834_s5 + $0xa0] sm:$0xff]  ;;  %v2867_v25 = vld [vmem:[%s4834_s5 + $0xa8] sm:$0xff] }
  0x40   : > { %v3482_v23 = vpack.c.bf16 %v2852_v21, %v2851_v20  ;;  %v2854_v27 = vld [vmem:[%s4833_s0 + $0xa8] sm:$0xff]  ;;  %v3503_v28 = vpack.c.bf16 %v2867_v25, %v2866_v24  ;;  %v2842_v30 = vld [vmem:[%s4836_s24] ss:$0 sm:$0xff]  ;;  %v2868_v39 = vld [vmem:[%s4834_s5 + $0xb0] sm:$0xff] }
  0x41   : > { %3462 = vmatpush3.bf16.msra.mxu0 %v3461_v26  ;;  %3447 = vmatpush3.bf16.msra.mxu1 %v3446_v31  ;;  %v2853_v26 = vld [vmem:[%s4833_s0 + $0xa0] sm:$0xff]  ;;  %v2869_v40 = vld [vmem:[%s4834_s5 + $0xb8] sm:$0xff]  ;;  %v2855_v42 = vld [vmem:[%s4833_s0 + $0xb0] sm:$0xff] }
  0x42   : > { %3463 = vmatprep.subr.bf16.mxu0 %v3797_v3  ;;  %3448 = vmatprep.subr.bf16.mxu1 %v3797_v3  ;;  %v3485_v29 = vpack.c.bf16 %v2854_v27, %v2853_v26  ;;  %v3506_v41 = vpack.c.bf16 %v2869_v40, %v2868_v39  ;;  %v1387_v63 = vld [vmem:[%s4840_s10 + $0x10] sm:$0xff]  ;;  %v1500_v13 = vld [vmem:[%s4844_s13] sm:$0xff]  ;;  %v1501_v14 = vld [vmem:[%s4844_s13 + $0x8] sm:$0xff] }
  0x43   : > { %v3539_v15 = vpack.c.bf16 %v1501_v14, %v1500_v13  ;;  %v1504_v19 = vld [vmem:[%s4844_s13 + $0x20] sm:$0xff]  ;;  %v1505_v20 = vld [vmem:[%s4844_s13 + $0x28] sm:$0xff] }
  0x44   : > { %v3545_v21 = vpack.c.bf16 %v1505_v20, %v1504_v19  ;;  %v1508_v25 = vld [vmem:[%s4844_s13 + $0x40] sm:$0xff]  ;;  %v1509_v26 = vld [vmem:[%s4844_s13 + $0x48] sm:$0xff] }
  0x45   : > { %3465 = vmatpush3.bf16.msra.mxu0 %v3464_v32  ;;  %3450 = vmatpush3.bf16.msra.mxu1 %v3449_v37  ;;  %v3551_v27 = vpack.c.bf16 %v1509_v26, %v1508_v25  ;;  %v1676_v19 = vld [vmem:[%s4772_s16 + $0x8] sm:$0xff]  ;;  %v2882_v26 = vld [vmem:[%s4771_s15] ss:$0 sm:$0xff] }
  0x46   : > { %3466 = vmatprep.subr.bf16.mxu0 %v3797_v3  ;;  %3451 = vmatprep.subr.bf16.mxu1 %v3797_v3 }
  0x49   : > { %3468 = vmatpush3.bf16.msra.mxu0 %v3467_v38  ;;  %3453 = vmatpush3.bf16.msra.mxu1 %v3452_v43  ;;  %v2856_v43 = vld [vmem:[%s4833_s0 + $0xb8] sm:$0xff]  ;;  %s4847_s0 = sld [smem:[#allocation23_spill]] }
  0x4a   : > { %3469 = vmatprep.subr.bf16.mxu0 %v3797_v3  ;;  %3472 = vmatprep.subr.bf16.mxu1 %v3797_v3  ;;  %v3488_v44 = vpack.c.bf16 %v2856_v43, %v2855_v42 }
  0x4d   : > { %3471 = vmatpush3.bf16.msra.mxu0 %v3470_v45  ;;  %v2840_v45 = vld [vmem:[%s4837_s25] ss:$0 sm:$0xff] }
  0x4e   : > { %3490 = vmatprep.subr.bf16.mxu0 %v3797_v3 }
 0x108   : > { %v871_v49 = vpop.f32.mrb[0].mxu0 }
 0x109   : > { %v4110_v50 = vadd.f32 %v2838_v47, %v871_v49  ;;  %v3105_v51 = vpop.f32.mrb[1].mxu0 }
 0x10b   : > { %890 = vrot.lane.b32.xlu0 %v4110_v50, %s4799_s23  ;;  %v883_v52 = vrot.slane %v4110_v50, 1  ;;  %v875_v55 = vrot.slane %v4110_v50, 7  ;;  %s4843_s23 = sld [smem:[#allocation22_spill]] }
 0x10d   : > { %v888_v53 = vsel %vm886_vm2, %v883_v52, 0.0  ;;  %v882_v57 = vsel %vm879_vm3, %v875_v55, 0.0 }
 0x10f   : > { %894 = vrot.lane.b32.xlu0 %v888_v53, %s4797_s6  ;;  %s787_s6 = scalar_lea.vmem %s4842_s28, %s4841_s3 }
 0x110   : > { %v4262_v4 = vld [vmem:[%s787_s6] sm:$0xff]  ;;  %s4805_s6 = sshll.u32 %s3955_s7, 7 }
 0x111   : > { %v1300_v7 = vld [vmem:[%s4843_s23 + $0x8] sm:$0xff]  ;;  %v1301_v9 = vld [vmem:[%s4843_s23 + $0x10] sm:$0xff]  ;;  %s4682_s3 = scalar_lea.hbm %s4848_s26, %s4805_s6 }
 0x17d   : > { %v891_v56 = vpop.permute.xlu0 %890 }
 0x17e   : > { %v897_v58 = vsel %vm801_vm1, %v882_v57, %v891_v56 }
 0x181   : > { %v895_v59 = vpop.permute.xlu0 %894 }
 0x182   : > { %v899_v60 = vsel %vm898_vm4, %v897_v58, %v895_v59  ;;  %v1386_v59 = vld [vmem:[%s4840_s10 + $0x8] sm:$0xff] }
 0x183   : > { %3131 = vmatmul.mubr.msk.f32.vlgmr.msra.gmra.mrb[0].mxu1 %vm932_vm5, %v899_v60  ;;  %3158 = vmatmul.mubr.msk.f32.vlgmr.msra.gmra.mrb[2].mxu0 %vm932_vm5, %v899_v60 }
 0x184   : > { %3184 = vmatprep.mubr.msk.f32.mxu1 %vm3798_vm0, %v3799_v6  ;;  %3211 = vmatprep.mubr.msk.f32.mxu0 %vm3798_vm0, %v3799_v6 }
 0x185   : > { %3492 = vmatpush3.bf16.msra.mxu0 %v3491_v0  ;;  %3474 = vmatpush3.bf16.msra.mxu1 %v3473_v5  ;;  %v1388_v0 = vld [vmem:[%s4840_s10 + $0x18] sm:$0xff]  ;;  %v1299_v5 = vld [vmem:[%s4843_s23] sm:$0xff] }
 0x186   : > { %3493 = vmatprep.subr.bf16.mxu0 %v3797_v3  ;;  %3475 = vmatprep.subr.bf16.mxu1 %v3797_v3  ;;  %v3518_v2 = vpack.c.bf16 %v1388_v0, %v1387_v63  ;;  %v1493_v63 = vld [vmem:[%s4846_s12 + $0x30] sm:$0xff]  ;;  %v1494_v0 = vld [vmem:[%s4846_s12 + $0x38] sm:$0xff] }
 0x189   : > { %3495 = vmatpush3.bf16.msra.mxu0 %v3494_v10  ;;  %3477 = vmatpush3.bf16.msra.mxu1 %v3476_v11  ;;  %v3509_v10 = vpack.c.bf16 %v1300_v7, %v1299_v5  ;;  %v1302_v11 = vld [vmem:[%s4843_s23 + $0x18] sm:$0xff]  ;;  %v1496_v5 = vld [vmem:[%s4846_s12 + $0x48] sm:$0xff] }
 0x18a   : > { %3496 = vmatprep.subr.bf16.mxu0 %v3797_v3  ;;  %3478 = vmatprep.subr.bf16.mxu1 %v3797_v3  ;;  %v3512_v12 = vpack.c.bf16 %v1302_v11, %v1301_v9  ;;  %v1497_v9 = vld [vmem:[%s4846_s12 + $0x50] sm:$0xff] }
 0x18d   : > { %3498 = vmatpush3.bf16.msra.mxu0 %v3497_v16  ;;  %3480 = vmatpush3.bf16.msra.mxu1 %v3479_v17  ;;  %v1502_v16 = vld [vmem:[%s4844_s13 + $0x10] sm:$0xff]  ;;  %v1503_v17 = vld [vmem:[%s4844_s13 + $0x18] sm:$0xff] }
 0x18e   : > { %3499 = vmatprep.subr.bf16.mxu0 %v3797_v3  ;;  %3481 = vmatprep.subr.bf16.mxu1 %v3797_v3  ;;  %v3542_v18 = vpack.c.bf16 %v1503_v17, %v1502_v16 }
 0x191   : > { %3501 = vmatpush3.bf16.msra.mxu0 %v3500_v22  ;;  %3483 = vmatpush3.bf16.msra.mxu1 %v3482_v23  ;;  %v1506_v22 = vld [vmem:[%s4844_s13 + $0x30] sm:$0xff]  ;;  %v1507_v23 = vld [vmem:[%s4844_s13 + $0x38] sm:$0xff] }
 0x192   : > { %3502 = vmatprep.subr.bf16.mxu0 %v3797_v3  ;;  %3484 = vmatprep.subr.bf16.mxu1 %v3797_v3  ;;  %v3548_v24 = vpack.c.bf16 %v1507_v23, %v1506_v22  ;;  %v1678_v22 = vld [vmem:[%s4772_s16 + $0x18] sm:$0xff] }
 0x195   : > { %3504 = vmatpush3.bf16.msra.mxu0 %v3503_v28  ;;  %3486 = vmatpush3.bf16.msra.mxu1 %v3485_v29  ;;  %v1510_v28 = vld [vmem:[%s4844_s13 + $0x50] sm:$0xff]  ;;  %v2873_v29 = vld [vmem:[%s4836_s24 + $0x1] ss:$0 sm:$0xff] }
 0x196   : > { %3505 = vmatprep.subr.bf16.mxu0 %v3797_v3  ;;  %3487 = vmatprep.subr.bf16.mxu1 %v3797_v3 }
 0x199   : > { %3507 = vmatpush3.bf16.msra.mxu0 %v3506_v41  ;;  %3489 = vmatpush3.bf16.msra.mxu1 %v3488_v44 }
 0x19a   : > { %3514 = vmatprep.subr.bf16.mxu0 %v3797_v3  ;;  %3508 = vmatprep.subr.bf16.mxu1 %v3797_v3 }
 0x256   : > { %v1002_v31 = vpop.f32.mrb[0].mxu1  ;;  %v1078_v32 = vpop.f32.mrb[2].mxu0 }
 0x257   : > { %v1079_v33 = vadd.f32 %v2842_v30, %v1078_v32  ;;  %v3132_v34 = vpop.f32.mrb[1].mxu1  ;;  %v3159_v35 = vpop.f32.mrb[3].mxu0  ;;  %v1003_v47 = vadd.f32 %v2840_v45, %v1002_v31  ;;  %v1511_v30 = vld [vmem:[%s4844_s13 + $0x58] sm:$0xff] }
 0x258   : > { %v3554_v31 = vpack.c.bf16 %v1511_v30, %v1510_v28 }
 0x259   : > { %v2844_v36 = vmul.f32 -1.442695, %v1079_v33 }
 0x25b   : > { %3677 = vpow2.f32 %v2844_v36 }
 0x265   : > { %v3678_v37 = vpop.eup %3677 }
 0x266   : > { %v1085_v38 = vadd.f32 1.0, %v3678_v37 }
 0x268   : > { %3679 = vrcp.f32 %v1085_v38  ;;  %v2878_v38 = vld [vmem:[%s4845_s11] ss:$0 sm:$0xff] }
 0x272   : > { %v3680_v49 = vpop.eup %3679 }
 0x273   : > { %v1088_v51 = vmul.f32 %v3680_v49, %v1003_v47  ;;  %v2871_v47 = vld [vmem:[%s4837_s25 + $0x1] ss:$0 sm:$0xff] }
 0x275   : > { %v1089_v52 = vadd.f32 %v1088_v51, %v4110_v50  ;;  %v1385_v50 = vld [vmem:[%s4840_s10] sm:$0xff] }
 0x276   : > { %v3515_v61 = vpack.c.bf16 %v1386_v59, %v1385_v50  ;;  %v1489_v59 = vld [vmem:[%s4846_s12 + $0x10] sm:$0xff] }
 0x277   : > { %v4225_v53 = vmul.f32 0.70710677, %v1089_v52 }
 0x279   : > { %1096 = vrot.lane.b32.xlu1 %v4225_v53, %s4838_s30  ;;  %v1093_v55 = vrot.slane %v4225_v53, 1  ;;  %v1091_v57 = vrot.slane %v4225_v53, 7 }
 0x27b   : > { %v1094_v56 = vsel %vm886_vm2, %v1093_v55, 0.0  ;;  %v1092_v60 = vsel %vm879_vm3, %v1091_v57, 0.0  ;;  %v1487_v55 = vld [vmem:[%s4846_s12] sm:$0xff] }
 0x27d   : > { %1100 = vrot.lane.b32.xlu1 %v1094_v56, %s4839_s9  ;;  %v1488_v56 = vld [vmem:[%s4846_s12 + $0x8] sm:$0xff] }
 0x2eb   : > { %v1097_v58 = vpop.permute.xlu1 %1096 }
 0x2ec   : > { %v1103_v48 = vsel %vm801_vm1, %v1092_v60, %v1097_v58  ;;  %v3521_v58 = vpack.c.bf16 %v1488_v56, %v1487_v55  ;;  %v1490_v60 = vld [vmem:[%s4846_s12 + $0x18] sm:$0xff] }
 0x2ef   : > { %v1101_v62 = vpop.permute.xlu1 %1100 }
 0x2f0   : > { %v1104_v1 = vsel %vm898_vm4, %v1103_v48, %v1101_v62  ;;  %v1492_v48 = vld [vmem:[%s4846_s12 + $0x28] sm:$0xff] }
 0x2f1   : > { %3185 = vmatmul.mubr.msk.f32.vlgmr.msra.gmra.mrb[2].mxu1 %vm932_vm5, %v1104_v1  ;;  %3212 = vmatmul.mubr.msk.f32.vlgmr.msra.gmra.mrb[4].mxu0 %vm932_vm5, %v1104_v1  ;;  %v3530_v1 = vpack.c.bf16 %v1494_v0, %v1493_v63  ;;  %v1925_v63 = vld [vmem:[%s4774_s18 + $0x18] sm:$0xff] }
 0x2f2   : > { %3516 = vmatpush3.bf16.msra.mxu0 %v3515_v61  ;;  %3233 = vmatprep.mubr.msk.f32.mxu0 %vm3798_vm0, %v3799_v6  ;;  %v3524_v61 = vpack.c.bf16 %v1490_v60, %v1489_v59 }
 0x2f3   : > { %3517 = vmatprep.subr.bf16.mxu0 %v3797_v3  ;;  %3222 = vmatprep.mubr.msk.f32.mxu1 %vm3798_vm0, %v3799_v6 }
 0x2f4   : > { %3510 = vmatpush3.bf16.msra.mxu1 %v3509_v10  ;;  %v1498_v10 = vld [vmem:[%s4846_s12 + $0x58] sm:$0xff] }
 0x2f5   : > { %3511 = vmatprep.subr.bf16.mxu1 %v3797_v3  ;;  %v3536_v11 = vpack.c.bf16 %v1498_v10, %v1497_v9  ;;  %v2905_v10 = vld [vmem:[%s4844_s13 + $0x60] sm:$0xff] }
 0x2f6   : > { %3519 = vmatpush3.bf16.msra.mxu0 %v3518_v2  ;;  %v1495_v2 = vld [vmem:[%s4846_s12 + $0x40] sm:$0xff] }
 0x2f7   : > { %3538 = vmatprep.subr.bf16.mxu0 %v3797_v3  ;;  %v3533_v7 = vpack.c.bf16 %v1496_v5, %v1495_v2 }
 0x2f8   : > { %3513 = vmatpush3.bf16.msra.mxu1 %v3512_v12  ;;  %v4389_v12 = vadd.s32 4294967294, %v4101_v46  ;;  %v1675_v46 = vld [vmem:[%s4772_s16] sm:$0xff] }
 0x2f9   : > { %3234 = vmatmul.mubr.msk.f32.vlgmr.msra.gmra.mrb[6].mxu0 %vm801_vm1, %v4262_v4  ;;  %3520 = vmatprep.subr.bf16.mxu1 %v3797_v3  ;;  %v4409_v20 = vpack.c.bf16 %v1676_v19, %v1675_v46  ;;  %v2894_v46 = vld [vmem:[%s4846_s12 + $0x70] sm:$0xff] }
 0x2fa   : > { %3287 = vmatprep.mubr.msk.f32.mxu0 %vm3798_vm0, %v3799_v6  ;;  %3540 = vmatpush3.bf16.msra.mxu0 %v3539_v15  ;;  %vm1471_vm6 = vcmp.ge.s32.totalorder %v4389_v12, 0 }
 0x2fb   : > { %3541 = vmatprep.subr.bf16.mxu0 %v3797_v3 }
 0x2fe   : > { %3543 = vmatpush3.bf16.msra.mxu0 %v3542_v18 }
 0x2ff   : > { %3544 = vmatprep.subr.bf16.mxu0 %v3797_v3 }
 0x302   : > { %3546 = vmatpush3.bf16.msra.mxu0 %v3545_v21  ;;  %v1677_v21 = vld [vmem:[%s4772_s16 + $0x10] sm:$0xff] }
 0x303   : > { %3547 = vmatprep.subr.bf16.mxu0 %v3797_v3  ;;  %v4419_v23 = vpack.c.bf16 %v1678_v22, %v1677_v21  ;;  %v2895_v21 = vld [vmem:[%s4846_s12 + $0x78] sm:$0xff]  ;;  %v2909_v22 = vld [vmem:[%s4844_s13 + $0x80] sm:$0xff] }
 0x306   : > { %3549 = vmatpush3.bf16.msra.mxu0 %v3548_v24 }
 0x307   : > { %3550 = vmatprep.subr.bf16.mxu0 %v3797_v3 }
 0x30a   : > { %3552 = vmatpush3.bf16.msra.mxu0 %v3551_v27 }
 0x30b   : > { %3553 = vmatprep.subr.bf16.mxu0 %v3797_v3 }
 0x30e   : > { %3555 = vmatpush3.bf16.msra.mxu0 %v3554_v31 }
 0x30f   : > { %3562 = vmatprep.subr.bf16.mxu0 %v3797_v3 }
 0x3c4   : > { %v1210_v32 = vpop.f32.mrb[2].mxu1  ;;  %v1286_v33 = vpop.f32.mrb[4].mxu0 }
 0x3c5   : > { %v1287_v34 = vadd.f32 %v2873_v29, %v1286_v33  ;;  %v3186_v35 = vpop.f32.mrb[3].mxu1  ;;  %v3213_v36 = vpop.f32.mrb[5].mxu0  ;;  %v1211_v49 = vadd.f32 %v2871_v47, %v1210_v32 }
 0x3c6   : > { %v2880_v35 = vld [vmem:[%s4770_s14] ss:$0 sm:$0xff] }
 0x3c7   : > { %v2875_v37 = vmul.f32 -1.442695, %v1287_v34  ;;  %v2876_v36 = vld [vmem:[%s4847_s0] ss:$0 sm:$0xff]  ;;  %s4634_s0 = scalar_lea.vmem [#allocation4], %s4804_s8 }
 0x3c8   : > { %s2727_s1 = sshll.u32 %s4634_s0, 4  ;;  %s2728_s1 = int_to_ptr.vmem [resolvable:$true] %s2727_s1 }
 0x3c9   : > { %3681 = vpow2.f32 %v2875_v37  ;;  %s3701_s28 = scalar_lea.vmem %s2728_s1, 128 }
 0x3ca   : > { %p3702_p11 = scmp.ne.s32.totalorder %s2728_s1, %s3701_s28 }
 0x3cc   : > { %v1465_v39 = vpop.f32.mrb[6].mxu0  ;;  %p3703_p12 = pnand %p3702_p11, %p3972_p5 }
 0x3cd   : > { %v4331_v40 = vadd.f32 %v2878_v38, %v1465_v39  ;;  %v3235_v41 = vpop.f32.mrb[7].mxu0 }
 0x3ce   : > { %p3704_p13 = pneg %p3703_p12 }
 0x3cf   : > { %1482 = vrot.lane.b32.xlu1 %v4331_v40, %s4839_s9  ;;  %v1475_v42 = vrot.slane %v4331_v40, 7  ;;  %v1469_v13 = vrot.slane %v4331_v40, 6 }
 0x3d1   : > { %v1476_v43 = vsel %vm879_vm3, %v1475_v42, 1.0  ;;  %v1474_v15 = vsel %vm1471_vm6, %v1469_v13, 1.0  ;;  %v4446_v42 = vld [vmem:[%s4773_s17] ss:$0 sm:$0xff]  ;;  %v2907_v13 = vld [vmem:[%s4844_s13 + $0x70] sm:$0xff] }
 0x3d2   : > { %1478 = vrot.lane.b32.xlu0 %v1476_v43, %s4838_s30 }
 0x3d3   : > { %v3682_v44 = vpop.eup %3681 }
 0x3d4   : > { %v1293_v45 = vadd.f32 1.0, %v3682_v44 }
 0x3d6   : > { %3683 = vrcp.f32 %v1293_v45 }
 0x3e0   : > { %v3684_v51 = vpop.eup %3683 }
 0x3e1   : > { %v1296_v52 = vmul.f32 %v3684_v51, %v1211_v49 }
 0x3e3   : > { %v1297_v57 = vadd.f32 %v1296_v52, %v4225_v53  ;;  %v1491_v53 = vld [vmem:[%s4846_s12 + $0x20] sm:$0xff] }
 0x3e4   : > { %v3527_v62 = vpack.c.bf16 %v1492_v48, %v1491_v53  ;;  %v1923_v53 = vld [vmem:[%s4774_s18 + $0x8] sm:$0xff]  ;;  %v1924_v48 = vld [vmem:[%s4774_s18 + $0x10] sm:$0xff] }
 0x3e5   : > { %v1298_v50 = vmul.f32 0.70710677, %v1297_v57  ;;  %v4476_v0 = vpack.c.bf16 %v1925_v63, %v1924_v48 }
 0x3e7   : > { %3223 = vmatmul.mubr.msk.f32.vlgmr.msra.gmra.mrb[4].mxu1 %vm801_vm1, %v1298_v50 }
 0x3e8   : > { %3522 = vmatpush3.bf16.msra.mxu1 %v3521_v58  ;;  %3260 = vmatprep.mubr.msk.f32.mxu1 %vm3798_vm0, %v3799_v6 }
 0x3e9   : > { %3523 = vmatprep.subr.bf16.mxu1 %v3797_v3 }
 0x3ec   : > { %3525 = vmatpush3.bf16.msra.mxu1 %v3524_v61  ;;  %v1922_v61 = vld [vmem:[%s4774_s18] sm:$0xff] }
 0x3ed   : > { %3526 = vmatprep.subr.bf16.mxu1 %v3797_v3 }
 0x3f0   : > { %3528 = vmatpush3.bf16.msra.mxu1 %v3527_v62  ;;  %v4470_v62 = vpack.c.bf16 %v1923_v53, %v1922_v61 }
 0x3f1   : > { %3529 = vmatprep.subr.bf16.mxu1 %v3797_v3 }
 0x3f4   : > { %3531 = vmatpush3.bf16.msra.mxu1 %v3530_v1 }
 0x3f5   : > { %3532 = vmatprep.subr.bf16.mxu1 %v3797_v3 }
 0x3f8   : > { %3534 = vmatpush3.bf16.msra.mxu1 %v3533_v7 }
 0x3f9   : > { %3535 = vmatprep.subr.bf16.mxu1 %v3797_v3 }
 0x3fc   : > { %3537 = vmatpush3.bf16.msra.mxu1 %v3536_v11  ;;  %v2906_v11 = vld [vmem:[%s4844_s13 + $0x68] sm:$0xff] }
 0x3fd   : > { %3556 = vmatprep.subr.bf16.mxu1 %v3797_v3 }
 0x441   : > { %v1483_v16 = vpop.permute.xlu1 %1482 }
 0x444   : > { %v1479_v14 = vpop.permute.xlu0 %1478 }
 0x445   : > { %v1485_v17 = vsel %vm801_vm1, %v1474_v15, %v1479_v14  ;;  %v3587_v14 = vpack.c.bf16 %v2906_v11, %v2905_v10  ;;  %v2908_v15 = vld [vmem:[%s4844_s13 + $0x78] sm:$0xff] }
 0x446   : > { %v1486_v18 = vsel %vm898_vm4, %v1485_v17, %v1483_v16  ;;  %v2892_v16 = vld [vmem:[%s4846_s12 + $0x60] sm:$0xff]  ;;  %v2893_v17 = vld [vmem:[%s4846_s12 + $0x68] sm:$0xff]  ;;  %v3590_v19 = vpack.c.bf16 %v2908_v15, %v2907_v13 }
 0x447   : > { %3261 = vmatmul.mubr.msk.f32.vlgmr.msra.gmra.mrb[6].mxu1 %vm932_vm5, %v1486_v18  ;;  %3288 = vmatmul.mubr.msk.f32.vlgmr.msra.gmra.mrb[8].mxu0 %vm932_vm5, %v1486_v18  ;;  %v3569_v18 = vpack.c.bf16 %v2893_v17, %v2892_v16 }
 0x448   : > { %3298 = vmatprep.mubr.msk.f32.mxu1 %vm3798_vm0, %v3799_v6  ;;  %3319 = vmatprep.mubr.msk.f32.mxu0 %vm3798_vm0, %v3799_v6 }
 0x449   : > { %3558 = vmatpush3.bf16.msra.mxu1 %v4409_v20  ;;  %3564 = vmatpush3.bf16.msra.mxu0 %v4470_v62 }
 0x44a   : > { %3559 = vmatprep.subr.bf16.mxu1 %v3797_v3  ;;  %3565 = vmatprep.subr.bf16.mxu0 %v3797_v3 }
 0x44d   : > { %3561 = vmatpush3.bf16.msra.mxu1 %v4419_v23  ;;  %3567 = vmatpush3.bf16.msra.mxu0 %v4476_v0 }
 0x44e   : > { %3301 = vmatprep.subr.mxu1 %v3799_v6  ;;  %3586 = vmatprep.subr.bf16.mxu0 %v3797_v3 }
 0x4ba   : > { %v1379_v24 = vpop.f32.mrb[4].mxu1 }
 0x4bb   : > { %v3224_v25 = vpop.f32.mrb[5].mxu1  ;;  %v4434_v41 = vadd.f32 %v2876_v36, %v1379_v24  ;;  %v2910_v24 = vld [vmem:[%s4844_s13 + $0x88] sm:$0xff] }
 0x4bc   : > { %v3572_v25 = vpack.c.bf16 %v2895_v21, %v2894_v46  ;;  %v2914_v36 = vld [vmem:[%s4844_s13 + $0xa8] sm:$0xff] }
 0x4bd   : > { %v1383_v47 = vadd.f32 %v4434_v41, %v4011_v8 }
 0x4bf   : > { %v4452_v52 = vmul.f32 0.70710677, %v1383_v47  ;;  %v2916_v47 = vld [vmem:[%s4844_s13 + $0xb8] sm:$0xff] }
 0x51a   : > { %v1588_v27 = vpop.f32.mrb[6].mxu1  ;;  %v1664_v28 = vpop.f32.mrb[8].mxu0 }
 0x51b   : > { %v1665_v29 = vadd.f32 %v2882_v26, %v1664_v28  ;;  %v3262_v30 = vpop.f32.mrb[7].mxu1  ;;  %v3289_v31 = vpop.f32.mrb[9].mxu0  ;;  %v1589_v37 = vadd.f32 %v2880_v35, %v1588_v27  ;;  %v2896_v26 = vld [vmem:[%s4846_s12 + $0x80] sm:$0xff]  ;;  %v2897_v27 = vld [vmem:[%s4846_s12 + $0x88] sm:$0xff]  ;;  %v3593_v28 = vpack.c.bf16 %v2910_v24, %v2909_v22 }
 0x51c   : > { %v2912_v30 = vld [vmem:[%s4844_s13 + $0x98] sm:$0xff]  ;;  %v3575_v31 = vpack.c.bf16 %v2897_v27, %v2896_v26  ;;  %v2913_v35 = vld [vmem:[%s4844_s13 + $0xa0] sm:$0xff] }
 0x51d   : > { %v2884_v32 = vmul.f32 -1.442695, %v1665_v29  ;;  %v2911_v29 = vld [vmem:[%s4844_s13 + $0x90] sm:$0xff] }
 0x51f   : > { %3685 = vpow2.f32 %v2884_v32  ;;  %v2898_v32 = vld [vmem:[%s4846_s12 + $0x90] sm:$0xff] }
 0x529   : > { %v3686_v33 = vpop.eup %3685 }
 0x52a   : > { %v1671_v34 = vadd.f32 1.0, %v3686_v33  ;;  %v2899_v33 = vld [vmem:[%s4846_s12 + $0x98] sm:$0xff] }
 0x52c   : > { %3687 = vrcp.f32 %v1671_v34  ;;  %v3596_v34 = vpack.c.bf16 %v2912_v30, %v2911_v29 }
 0x536   : > { %v3688_v38 = vpop.eup %3687 }
 0x537   : > { %v4432_v39 = vmul.f32 %v3688_v38, %v1589_v37  ;;  %v3578_v37 = vpack.c.bf16 %v2899_v33, %v2898_v32  ;;  %v2900_v38 = vld [vmem:[%s4846_s12 + $0xa0] sm:$0xff] }
 0x538   : > { %v2525_v33 = vld [vmem:[%s4776_s20] sm:$0xff] }
 0x539   : > { %3299 = vmatmul.mubr.msk.f32.vlgmr.msra.gmra.mrb[8].mxu1 %vm801_vm1, %v4432_v39 }
 0x53a   : > { %3302 = vmatpush3.xpose.msk.msra.mxu1 %vm801_vm1, %v4434_v41  ;;  %3303 = vmatprep.mubr.msk.f32.mxu1 %vm3798_vm0, %v3799_v6 }
 0x53b   : > { %3306 = vmatprep.subr.mxu1 %v3799_v6 }
 0x60c   : > { %v1755_v43 = vpop.f32.mrb[8].mxu1 }
 0x60d   : > { %v1756_v44 = vadd.f32 %v4446_v42, %v1755_v43  ;;  %v3300_v45 = vpop.f32.mrb[9].mxu1  ;;  %v2901_v43 = vld [vmem:[%s4846_s12 + $0xa8] sm:$0xff] }
 0x60e   : > { %v2915_v45 = vld [vmem:[%s4844_s13 + $0xb0] sm:$0xff] }
 0x60f   : > { %v1759_v49 = vadd.f32 %v1756_v44, %v4262_v4  ;;  %v3599_v44 = vpack.c.bf16 %v2914_v36, %v2913_v35  ;;  %v2527_v36 = vld [vmem:[%s4776_s20 + $0x10] sm:$0xff] }
 0x611   : > { %v1760_v51 = vmul.f32 0.70710677, %v1759_v49  ;;  %v3581_v49 = vpack.c.bf16 %v2901_v43, %v2900_v38  ;;  %v2609_v38 = vld [vmem:[%s4778_s22] sm:$0xff]  ;;  %v2610_v43 = vld [vmem:[%s4778_s22 + $0x8] sm:$0xff] }
 0x613   : > { %3304 = vmatmul.mubr.msk.f32.vlgmr.msra.gmra.mrb[10].mxu1 %vm801_vm1, %v1760_v51  ;;  %v3602_v51 = vpack.c.bf16 %v2916_v47, %v2915_v45 }
 0x614   : > { %3307 = vmatpush3.msra.mxu1 %v4452_v52  ;;  %3308 = vmatprep.mubr.msk.f32.mxu1 %vm3798_vm0, %v3799_v6 }
 0x615   : > { %3568 = vmatprep.subr.bf16.mxu1 %v3797_v3 }
 0x6e6   : > { %v1833_v55 = vpop.f32.mrb[10].mxu1 }
 0x6e7   : > { %v3305_v56 = vpop.f32.mrb[11].mxu1  ;;  %v1838_v57 = vsel %vm1837_vm7, %v1833_v55, -inf }
 0x6e8   : > { %1839 = vmax.xlane.f32.xlu0 %v1838_v57  ;;  %v2903_v56 = vld [vmem:[%s4846_s12 + $0xb8] sm:$0xff]  ;;  %v4573_v57 = vld [vmem:[%s4775_s19] ss:$0 sm:$0xff] }
 0x775   : > { %v1840_v8 = vpop.xlane.xlu0 %1839 }
 0x776   : > { %v1841_v58 = vsub.f32 %v1833_v55, %v1840_v8  ;;  %v2902_v55 = vld [vmem:[%s4846_s12 + $0xb0] sm:$0xff] }
 0x777   : > { %v3584_v8 = vpack.c.bf16 %v2903_v56, %v2902_v55 }
 0x778   : > { %v1842_v50 = vmul.f32 1.442695, %v1841_v58 }
 0x77a   : > { %3689 = vpow2.f32 %v1842_v50 }
 0x784   : > { %v3690_v59 = vpop.eup %3689 }
 0x785   : > { %v1844_v60 = vsel %vm1837_vm7, %v3690_v59, 0.0 }
 0x786   : > { %1845 = vadd.xlane.f32.xlu1 %v1844_v60 }
 0x813   : > { %v1846_v1 = vpop.xlane.xlu1 %1845 }
 0x814   : > { %3691 = vrcp.f32 %v1846_v1 }
 0x81e   : > { %v3692_v2 = vpop.eup %3691 }
 0x81f   : > { %v1848_v5 = vmul.f32 %v3692_v2, %v3690_v59 }
 0x821   : > { %3309 = vmatmul.mubr.msk.f32.vlgmr.msra.gmra.mrb[12].mxu1 %vm1837_vm7, %v1848_v5 }
 0x822   : > { %3346 = vmatprep.mubr.msk.f32.mxu1 %vm3798_vm0, %v3799_v6  ;;  %3570 = vmatpush3.bf16.msra.mxu1 %v3569_v18 }
 0x823   : > { %3571 = vmatprep.subr.bf16.mxu1 %v3797_v3 }
 0x826   : > { %3573 = vmatpush3.bf16.msra.mxu1 %v3572_v25 }
 0x827   : > { %3574 = vmatprep.subr.bf16.mxu1 %v3797_v3 }
 0x82a   : > { %3576 = vmatpush3.bf16.msra.mxu1 %v3575_v31 }
 0x82b   : > { %3577 = vmatprep.subr.bf16.mxu1 %v3797_v3 }
 0x82e   : > { %3579 = vmatpush3.bf16.msra.mxu1 %v3578_v37 }
 0x82f   : > { %3580 = vmatprep.subr.bf16.mxu1 %v3797_v3 }
 0x832   : > { %3582 = vmatpush3.bf16.msra.mxu1 %v3581_v49 }
 0x833   : > { %3583 = vmatprep.subr.bf16.mxu1 %v3797_v3 }
 0x836   : > { %3585 = vmatpush3.bf16.msra.mxu1 %v3584_v8 }
 0x837   : > { %3604 = vmatprep.subr.bf16.mxu1 %v3797_v3 }
 0x8f4   : > { %v1918_v7 = vpop.f32.mrb[12].mxu1 }
 0x8f5   : > { %v3310_v9 = vpop.f32.mrb[13].mxu1  ;;  %3320 = vmatmul.mubr.msk.f32.vlgmr.msra.gmra.mrb[10].mxu0 %vm801_vm1, %v1918_v7 }
 0x8f6   : > { %3373 = vmatprep.mubr.msk.f32.mxu0 %vm3798_vm0, %v3799_v6  ;;  %3588 = vmatpush3.bf16.msra.mxu0 %v3587_v14 }
 0x8f7   : > { %3589 = vmatprep.subr.bf16.mxu0 %v3797_v3 }
 0x8fa   : > { %3591 = vmatpush3.bf16.msra.mxu0 %v3590_v19 }
 0x8fb   : > { %3592 = vmatprep.subr.bf16.mxu0 %v3797_v3 }
 0x8fe   : > { %3594 = vmatpush3.bf16.msra.mxu0 %v3593_v28 }
 0x8ff   : > { %3595 = vmatprep.subr.bf16.mxu0 %v3797_v3 }
 0x902   : > { %3597 = vmatpush3.bf16.msra.mxu0 %v3596_v34  ;;  %v2526_v34 = vld [vmem:[%s4776_s20 + $0x8] sm:$0xff] }
 0x903   : > { %3598 = vmatprep.subr.bf16.mxu0 %v3797_v3  ;;  %v3617_v35 = vpack.c.bf16 %v2526_v34, %v2525_v33 }
 0x906   : > { %3600 = vmatpush3.bf16.msra.mxu0 %v3599_v44  ;;  %v3623_v44 = vpack.c.bf16 %v2610_v43, %v2609_v38 }
 0x907   : > { %3601 = vmatprep.subr.bf16.mxu0 %v3797_v3 }
 0x90a   : > { %3603 = vmatpush3.bf16.msra.mxu0 %v3602_v51 }
 0x90b   : > { %3387 = vmatprep.subr.mxu0 %v3799_v6 }
 0x9c8   : > { %v2002_v58 = vpop.f32.mrb[10].mxu0 }
 0x9c9   : > { %v2003_v50 = vadd.f32 %v4573_v57, %v2002_v58  ;;  %v3321_v59 = vpop.f32.mrb[11].mxu0  ;;  %v2611_v58 = vld [vmem:[%s4778_s22 + $0x10] sm:$0xff] }
 0x9cb   : > { %v2006_v60 = vadd.f32 %v2003_v50, %v4432_v39  ;;  %v2928_v50 = vld [vmem:[%s4777_s21] ss:$0 sm:$0xff] }
 0x9cd   : > { %v2007_v61 = vmul.f32 0.70710677, %v2006_v60 }
 0x9cf   : > { %v2008_v53 = vadd.f32 %v2007_v61, %v4331_v40 }
 0x9d1   : > { %v4579_v48 = vmul.f32 0.70710677, %v2008_v53 }
 0x9d3   : > { %2019 = vrot.lane.b32.xlu1 %v4579_v48, %s4839_s9  ;;  %v2012_v63 = vrot.slane %v4579_v48, 7  ;;  %v2010_v2 = vrot.slane %v4579_v48, 6 }
 0x9d5   : > { %v2013_v1 = vsel %vm879_vm3, %v2012_v63, 1.0  ;;  %v2011_v39 = vsel %vm1471_vm6, %v2010_v2, 1.0 }
 0x9d6   : > { %2015 = vrot.lane.b32.xlu0 %v2013_v1, %s4838_s30  ;;  %s3802_s30 = smov [#allocation4]  }
 0x9d7   : > { %s3705_s9 = sshll.u32 %s3802_s30, 4  ;;  %s3706_s9 = int_to_ptr.vmem [resolvable:$false] %s3705_s9 }
 0x9d8   : > { %s3707_s8 = scalar_lea.vmem %s3706_s9, 256  ;;  %p3708_p0 = scmp.lt.s32.totalorder %s2728_s1, %s3706_s9 }
 0x9d9   : > { %p3709_p1 = scmp.lt.s32.totalorder %s3707_s8, %s3701_s28 }
 0x9db   : > { %p3710_p2 = por %p3709_p1, %p3708_p0 }
 0x9dd   : > { %p3711_p3 = pnand %p3710_p2, %p3704_p13 }
 0xa45   : > { %v2020_v7 = vpop.permute.xlu1 %2019 }
 0xa48   : > { %v2016_v5 = vpop.permute.xlu0 %2015 }
 0xa49   : > { %v2022_v40 = vsel %vm801_vm1, %v2011_v39, %v2016_v5 }
 0xa4a   : > { %v2023_v9 = vsel %vm898_vm4, %v2022_v40, %v2020_v7 }
 0xa4b   : > { %3347 = vmatmul.mubr.msk.f32.vlgmr.msra.gmra.mrb[14].mxu1 %vm932_vm5, %v2023_v9  ;;  %3374 = vmatmul.mubr.msk.f32.vlgmr.msra.gmra.mrb[12].mxu0 %vm932_vm5, %v2023_v9 }
 0xa4c   : > { %3388 = vmatpush3.xpose.msk.msra.mxu0 %vm801_vm1, %v4434_v41  ;;  %3606 = vmatpush3.bf16.msra.mxu1 %v4409_v20 }
 0xa4d   : > { %3607 = vmatprep.subr.bf16.mxu1 %v3797_v3  ;;  %3384 = vmatprep.mubr.msk.f32.mxu1 %vm3798_vm0, %v3799_v6 }
 0xa4e   : > { %3389 = vmatprep.mubr.msk.f32.mxu0 %vm3798_vm0, %v3799_v6  ;;  %3610 = vmatprep.subr.bf16.mxu0 %v3797_v3 }
 0xa50   : > { %3609 = vmatpush3.bf16.msra.mxu1 %v4419_v23  ;;  %v2918_v23 = vld [vmem:[%s4770_s14 + $0x1] ss:$0 sm:$0xff] }
 0xa51   : > { %3392 = vmatprep.subr.mxu1 %v3799_v6 }
 0xb1e   : > { %v2129_v12 = vpop.f32.mrb[14].mxu1  ;;  %v2205_v20 = vpop.f32.mrb[12].mxu0 }
 0xb1f   : > { %v2206_v41 = vadd.f32 %v2920_v54, %v2205_v20  ;;  %v3348_v10 = vpop.f32.mrb[15].mxu1  ;;  %v3375_v11 = vpop.f32.mrb[13].mxu0  ;;  %v2130_v16 = vadd.f32 %v2918_v23, %v2129_v12 }
 0xb21   : > { %v2922_v13 = vmul.f32 -1.442695, %v2206_v41 }
 0xb23   : > { %3693 = vpow2.f32 %v2922_v13 }
 0xb2d   : > { %v3694_v14 = vpop.eup %3693 }
 0xb2e   : > { %v2212_v15 = vadd.f32 1.0, %v3694_v14 }
 0xb30   : > { %3695 = vrcp.f32 %v2212_v15 }
 0xb3a   : > { %v3696_v17 = vpop.eup %3695 }
 0xb3b   : > { %v2215_v18 = vmul.f32 %v3696_v17, %v2130_v16 }
 0xb3d   : > { %3385 = vmatmul.mubr.msk.f32.vlgmr.msra.gmra.mrb[16].mxu1 %vm801_vm1, %v2215_v18 }
 0xb3e   : > { %3393 = vmatpush3.msra.mxu1 %v4452_v52  ;;  %3394 = vmatprep.mubr.msk.f32.mxu1 %vm3798_vm0, %v3799_v6 }
 0xb3f   : > { %3616 = vmatprep.subr.bf16.mxu1 %v3797_v3 }
 0xc10   : > { %v2285_v46 = vpop.f32.mrb[16].mxu1 }
 0xc11   : > { %v2286_v19 = vadd.f32 %v4446_v42, %v2285_v46  ;;  %v3386_v21 = vpop.f32.mrb[17].mxu1 }
 0xc13   : > { %v2289_v22 = vadd.f32 %v2286_v19, %v4262_v4 }
 0xc15   : > { %v2290_v24 = vmul.f32 0.70710677, %v2289_v22 }
 0xc17   : > { %3390 = vmatmul.mubr.msk.f32.vlgmr.msra.gmra.mrb[14].mxu0 %vm801_vm1, %v2290_v24 }
 0xc18   : > { %3612 = vmatpush3.bf16.msra.mxu0 %v4470_v62  ;;  %3405 = vmatprep.mubr.msk.f32.mxu0 %vm3798_vm0, %v3799_v6 }
 0xc19   : > { %3613 = vmatprep.subr.bf16.mxu0 %v3797_v3 }
 0xc1c   : > { %3615 = vmatpush3.bf16.msra.mxu0 %v4476_v0 }
 0xc1d   : > { %3622 = vmatprep.subr.bf16.mxu0 %v3797_v3 }
 0xcea   : > { %v2360_v52 = vpop.f32.mrb[14].mxu0 }
 0xceb   : > { %v3391_v42 = vpop.f32.mrb[15].mxu0  ;;  %v2364_v25 = vsel %vm1837_vm7, %v2360_v52, -inf }
 0xcec   : > { %2365 = vmax.xlane.f32.xlu0 %v2364_v25 }
 0xd79   : > { %v2366_v4 = vpop.xlane.xlu0 %2365 }
 0xd7a   : > { %v2367_v26 = vsub.f32 %v2360_v52, %v2366_v4 }
 0xd7c   : > { %v2368_v27 = vmul.f32 1.442695, %v2367_v26 }
 0xd7e   : > { %3697 = vpow2.f32 %v2368_v27 }
 0xd88   : > { %v3698_v62 = vpop.eup %3697 }
 0xd89   : > { %v2370_v28 = vsel %vm1837_vm7, %v3698_v62, 0.0 }
 0xd8a   : > { %2371 = vadd.xlane.f32.xlu1 %v2370_v28 }
 0xe17   : > { %v2372_v29 = vpop.xlane.xlu1 %2371 }
 0xe18   : > { %3699 = vrcp.f32 %v2372_v29 }
 0xe22   : > { %v3700_v0 = vpop.eup %3699 }
 0xe23   : > { %v2374_v30 = vmul.f32 %v3700_v0, %v3698_v62 }
 0xe25   : > { %3395 = vmatmul.mubr.msk.f32.vlgmr.msra.gmra.mrb[18].mxu1 %vm1837_vm7, %v2374_v30  ;;  %2694 = vst.msk [vmem:[%s4634_s0] sm:$0xff] %vm1837_vm7, %v2374_v30 }
 0xe26   : > { %3416 = vmatprep.mubr.msk.f32.mxu1 %vm3798_vm0, %v3799_v6  ;;  %3618 = vmatpush3.bf16.msra.mxu1 %v3617_v35 }
 0xe27   : > { %3619 = vmatprep.subr.bf16.mxu1 %v3797_v3 }
 0xef8   : > { %v2444_v31 = vpop.f32.mrb[18].mxu1 }
 0xef9   : > { %v3396_v32 = vpop.f32.mrb[19].mxu1  ;;  %3406 = vmatmul.mubr.msk.f32.vlgmr.msra.gmra.mrb[16].mxu0 %vm801_vm1, %v2444_v31 }
 0xefa   : > { %3427 = vmatprep.mubr.msk.f32.mxu0 %vm3798_vm0, %v3799_v6  ;;  %v2528_v6 = vld [vmem:[%s4776_s20 + $0x18] sm:$0xff]  ;;  %3624 = vmatpush3.bf16.msra.mxu0 %v3623_v44 }
 0xefb   : > { %v3620_v37 = vpack.c.bf16 %v2528_v6, %v2527_v36  ;;  %3625 = vmatprep.subr.bf16.mxu0 %v3797_v3  ;;  %v2612_v3 = vld [vmem:[%s4778_s22 + $0x18] sm:$0xff] }
 0xefd   : > { %3621 = vmatpush3.bf16.msra.mxu1 %v3620_v37 }
 0xfcc   : > { %v2517_v45 = vpop.f32.mrb[16].mxu0 }
 0xfcd   : > { %v2518_v47 = vadd.f32 %v4573_v57, %v2517_v45  ;;  %v3407_v49 = vpop.f32.mrb[17].mxu0  ;;  %v3626_v57 = vpack.c.bf16 %v2612_v3, %v2611_v58 }
 0xfcf   : > { %v2521_v51 = vadd.f32 %v2518_v47, %v2215_v18  ;;  %3627 = vmatpush3.bf16.msra.mxu0 %v3626_v57 }
 0xfd1   : > { %v2522_v55 = vmul.f32 0.70710677, %v2521_v51 }
 0xfd3   : > { %v2523_v56 = vadd.f32 %v2522_v55, %v4579_v48 }
 0xfd5   : > { %v2524_v8 = vmul.f32 0.70710677, %v2523_v56 }
 0xfd7   : > { %3417 = vmatmul.mubr.msk.f32.vlgmr.msra.gmra.mrb[20].mxu1 %vm801_vm1, %v2524_v8 }
0x10aa   : > { %v2605_v59 = vpop.f32.mrb[20].mxu1 }
0x10ab   : > { %v2606_v60 = vadd.f32 %v2928_v50, %v2605_v59  ;;  %v3418_v61 = vpop.f32.mrb[21].mxu1 }
0x10ad   : > { %3428 = vmatmul.mubr.msk.f32.vlgmr.msra.gmra.mrb[18].mxu0 %vm801_vm1, %v2606_v60 }
0x10ae   : > { %3714 = shalt.err (!%p3711_p3)
}
0x10af   : > { %s3715_s0 = scalar_lea.hbm %s4682_s3, 128  ;;  %s3719_s30 = scalar_lea.hbm %s4848_s26, 256 }
0x10b0   : > { %p3716_p4 = scmp.ne.s32.totalorder %s4682_s3, %s3715_s0  ;;  %p3720_p9 = scmp.lt.u32.totalorder %s4682_s3, %s4848_s26 }
0x10b1   : > { %p3721_p10 = scmp.lt.u32.totalorder %s3719_s30, %s3715_s0  ;;  %p3723_p12 = scmp.lt.u32.totalorder %s3715_s0, %s4682_s3 }
0x10b2   : > { %p3717_p7 = pnand %p3716_p4, %p3972_p5 }
0x10b3   : > { %p3722_p11 = por %p3721_p10, %p3720_p9 }
0x10b4   : > { %p3718_p8 = pneg %p3717_p7 }
0x10b5   : > { %p3724_p13 = por %p3723_p12, %p3722_p11 }
0x10b7   : > { %p3725_p0 = pnand %p3724_p13, %p3718_p8 }
0x10b9   : > { %3728 = shalt.err (!%p3725_p0)
}
0x10ba   : > { %3629 = dma.vmem_to_hbm [thread:$0]  (%p3972_p5), %s2728_s1, 128, %s4682_s3, %s2701_s29  }
0x10bb   : > { %s4849_s10 = sld [smem:[#allocation28_spill]]  ;;  %s4850_s6 = sshll.u32 %s4628_s27, 3 }
0x10bc   : > { %s772_s5 = scalar_lea.vmem [#allocation2], %s4850_s6  ;;  %s4851_s0 = sshll.u32 %s3955_s7, 7 }
0x10bd   : > { %s2714_s30 = sshll.u32 %s772_s5, 4  ;;  %s4852_s12 = sld [smem:[#allocation29_spill]]  ;;  %s4715_s30 = int_to_ptr.vmem [resolvable:$true] %s2714_s30 }
0x10be   : > { %s2696_s3 = scalar_lea.sflag [#allocation3], %s4628_s27  ;;  %s3729_s1 = scalar_lea.vmem %s4715_s30, 128 }
0x10bf   : > { %p3730_p1 = scmp.ne.s32.totalorder %s4715_s30, %s3729_s1  ;;  %s3803_s29 = smov [#allocation2]  }
0x10c0   : > { %s3733_s8 = sshll.u32 %s3803_s29, 4  ;;  %s3734_s8 = int_to_ptr.vmem [resolvable:$false] %s3733_s8 }
0x10c1   : > { %v2930_v53 = vld [vmem:[%s4849_s10] ss:$0 sm:$0xff]  ;;  %p3731_p2 = pnand %p3730_p1, %p3972_p5  ;;  %s3735_s7 = scalar_lea.vmem %s3734_s8, 256 }
0x10c2   : > { %p3736_p4 = scmp.lt.s32.totalorder %s4715_s30, %s3734_s8  ;;  %p3737_p7 = scmp.lt.s32.totalorder %s3735_s7, %s3729_s1 }
0x10c3   : > { %s4713_s13 = scalar_lea.hbm %s4852_s12, %s4851_s0  ;;  %p3732_p3 = pneg %p3731_p2 }
0x10c4   : > { %p3738_p8 = por %p3737_p7, %p3736_p4 }
0x10c6   : > { %p3739_p9 = pnand %p3738_p8, %p3732_p3 }
0x1180   : > { %v2689_v48 = vpop.f32.mrb[18].mxu0 }
0x1181   : > { %v2690_v63 = vadd.f32 %v2930_v53, %v2689_v48  ;;  %v3429_v1 = vpop.f32.mrb[19].mxu0 }
0x1183   : > { %2693 = vst [vmem:[%s772_s5] sm:$0xff] %v2690_v63 }
0x1184   : > { %3742 = shalt.err (!%p3739_p9)
}
0x1185   : > { %s3743_s11 = scalar_lea.hbm %s4713_s13, 128  ;;  %s3747_s10 = scalar_lea.hbm %s4852_s12, 256 }
0x1186   : > { %p3744_p10 = scmp.ne.s32.totalorder %s4713_s13, %s3743_s11  ;;  %p3748_p13 = scmp.lt.u32.totalorder %s4713_s13, %s4852_s12 }
0x1187   : > { %p3749_p0 = scmp.lt.u32.totalorder %s3747_s10, %s3743_s11  ;;  %p3751_p2 = scmp.lt.u32.totalorder %s3743_s11, %s4713_s13 }
0x1188   : > { %p3745_p11 = pnand %p3744_p10, %p3972_p5 }
0x1189   : > { %p3750_p1 = por %p3749_p0, %p3748_p13 }
0x118a   : > { %p3746_p12 = pneg %p3745_p11 }
0x118b   : > { %p3752_p3 = por %p3751_p2, %p3750_p1 }
0x118d   : > { %p3753_p4 = pnand %p3752_p3, %p3746_p12 }
0x118f   : > { %3756 = shalt.err (!%p3753_p4)
}
0x1190   : > { %3628 = dma.vmem_to_hbm [thread:$0]  (%p3972_p5), %s4715_s30, 128, %s4713_s13, %s2696_s3  }
0x1191 PF: > { %s4853_s0 = sld [smem:[#allocation10_spill]]  ;;  %s4854_s9 = sld [smem:[#allocation8_spill]] }
0x1197   : > { %p3639_p7 = scmp.ge.s32.totalorder %s4853_s0, 2  ;;  %s2739_s29 = sand.u32 1, %s4854_s9  }
0x1198   : > { %s2740_s8 = scalar_lea.sflag [#allocation3], %s2739_s29 }
0x1199   : > { %p3633_p8 = pnand %p3639_p7, %p3976_p6 }
0x119b   : > { %3774 = dma.done.wait (!%p3633_p8), %s2740_s8, 128  }
0x119c   : > { %3776 = vsyncadd (!%p3633_p8), %s2740_s8, 4294967168  ;;  %s2749_s7 = scalar_lea.sflag [#allocation5], %s2739_s29 }
0x119d   : > { %3778 = dma.done.wait (!%p3633_p8), %s2749_s7, 128  }
0x119e   : > { %3780 = vsyncadd (!%p3633_p8), %s2749_s7, 4294967168  ;;  %s4856_s30 = sld [smem:[#allocation11_spill]]  ;;  %s4857_s4 = sld [smem:[#allocation9_spill]] }
0x119f   : > { %s4858_s6 = sld [smem:[#allocation12_spill]]  ;;  %s4859_s29 = smov %s3787_s2 }
0x11a4   : > { %p39_p5 = scmp.ge.s32.totalorder %s4856_s30, 4   ;;  %s4860_s2 = smov %s4857_s4 }
0x11a6   :  { %41 = sbr.rel (!%p39_p5) target bundleno = 23 (0x17), region = 179 }
0x11ad   :  { %2754 = vsyncpa [#allocation3], 1 }
0x11ae   :  { %2756 = vsyncpa [#allocation3 + $0x1], 1 }
0x11af   :  { %2757 = vsyncpa [#allocation5], 1 }
0x11b0   :  { %2759 = vsyncpa [#allocation5 + $0x1], 1 }

</bundles_post_ra>
